<compile_context>
chip_gen: v6e
topology: v6e:2x2x1
jax: 0.10.0
libtpu: 0.0.40
codegen_flags: <defaults>
</compile_context>

<pallas_src>
import functools

import jax
import jax.numpy as jnp
from jax.experimental import pallas as pl
from jax.experimental.pallas import tpu as pltpu


def _round_up(a, b):
    return (a + b - 1) // b * b


def _vmem_limit_bytes():
    """Generation-aware VMEM cap: ~3/4 of physical, never above 96 MiB."""
    cap = 128 * 1024 * 1024
    try:
        cap = int(pltpu.get_tpu_info().vmem_capacity_bytes)
    except Exception:
        try:
            if "v7" in jax.devices()[0].device_kind.lower():
                cap = 64 * 1024 * 1024
        except Exception:
            pass
    return max(32 * 1024 * 1024, min(cap * 3 // 4, 96 * 1024 * 1024))


def _has_bf16_eup():
    """v6e / v7x have bf16 VPU+EUP; v5e and older do not."""
    try:
        kind = jax.devices()[0].device_kind.lower()
    except Exception:
        return False
    return any(t in kind for t in ("v6", "v7", "trillium"))


# --------------------------------------------------------------------------
# Kernel A: encoder (2 layers) + decoder layer 1, layer-1 K-dim streamed.
# --------------------------------------------------------------------------
def _encoder_kernel(x_ref, w1_ref, b1_ref, w2_ref, b2_ref, w3_ref, b3_ref,
                    h_ref, acc_ref):
    k = pl.program_id(1)

    @pl.when(k == 0)
    def _init():
        acc_ref[...] = jnp.zeros_like(acc_ref)

    # Layer-1 partial product; x is cast f32 -> bf16 per chunk, in-kernel.
    acc_ref[...] += jnp.dot(x_ref[...].astype(jnp.bfloat16), w1_ref[...],
                            preferred_element_type=jnp.float32)

    @pl.when(k == pl.num_programs(1) - 1)
    def _finish():
        h = jnp.maximum(acc_ref[...] + b1_ref[...], 0.0).astype(jnp.bfloat16)
        h = jnp.dot(h, w2_ref[...], preferred_element_type=jnp.float32)
        h = jnp.maximum(h + b2_ref[...], 0.0).astype(jnp.bfloat16)
        h = jnp.dot(h, w3_ref[...], preferred_element_type=jnp.float32)
        h = jnp.maximum(h + b3_ref[...], 0.0)
        h_ref[...] = h.astype(h_ref.dtype)      # bf16 hidden to HBM (tiny)


# --------------------------------------------------------------------------
# Kernel B: decoder final Linear + Sigmoid, lane-dense column tiles.
# --------------------------------------------------------------------------
def _decoder_kernel(h_ref, w4_ref, b4_ref, out_ref, *, bf16_eup):
    logits = jnp.dot(h_ref[...], w4_ref[...],
                     preferred_element_type=jnp.float32) + b4_ref[...]
    if bf16_eup:
        logits = logits.astype(jnp.bfloat16)
    out_ref[...] = jax.nn.sigmoid(logits).astype(out_ref.dtype)


def multivae_forward(x, params, *, batch_tile=512, item_tile=1024,
                     out_dtype=jnp.bfloat16):
    """x: [B, num_items] float32 (normalized implicit-feedback rows).
    params: pre-transposed weights (in_features, out_features) + (1, out) biases."""
    B, N = x.shape
    w1 = params["w1"].astype(jnp.bfloat16)     # (N, h0)
    w2 = params["w2"].astype(jnp.bfloat16)     # (h0, h1)
    w3 = params["w3"].astype(jnp.bfloat16)     # (h1, h0)
    w4 = params["w4"].astype(jnp.bfloat16)     # (h0, N)
    b1 = params["b1"].reshape(1, -1).astype(jnp.float32)
    b2 = params["b2"].reshape(1, -1).astype(jnp.float32)
    b3 = params["b3"].reshape(1, -1).astype(jnp.float32)
    b4 = params["b4"].reshape(1, -1).astype(jnp.float32)
    h0, h1 = w2.shape[0], w2.shape[1]
    assert w1.shape == (N, h0) and w3.shape == (h1, h0) and w4.shape == (h0, N)

    # ---- tile sizes + zero padding to the tile grid (exact, sliced off) ----
    B_pad = _round_up(B, 8)
    tm = min(batch_tile, B_pad)
    tm = max(8, tm - tm % 8)
    B_pad = _round_up(B_pad, tm)

    N_pad = _round_up(N, 128)
    tn = min(item_tile, N_pad)
    tn = max(128, tn - tn % 128)
    N_pad = _round_up(N_pad, tn)

    x_p = x.astype(jnp.float32)
    if (B_pad, N_pad) != (B, N):
        x_p = jnp.pad(x_p, ((0, B_pad - B), (0, N_pad - N)))
    if N_pad != N:
        w1 = jnp.pad(w1, ((0, N_pad - N), (0, 0)))
        w4 = jnp.pad(w4, ((0, 0), (0, N_pad - N)))
        b4 = jnp.pad(b4, ((0, 0), (0, N_pad - N)))

    vmem_limit = _vmem_limit_bytes()
    grid = (B_pad // tm, N_pad // tn)

    # ------------------ kernel A: hidden representation ------------------
    flops_a = 2 * B_pad * (N_pad * h0 + h0 * h1 + h1 * h0)
    bytes_a = (B_pad * N_pad * 4 + 2 * (w1.size + w2.size + w3.size)
               + 4 * (b1.size + b2.size + b3.size) + 2 * B_pad * h0)
    h = pl.pallas_call(
        _encoder_kernel,
        out_shape=jax.ShapeDtypeStruct((B_pad, h0), jnp.bfloat16),
        grid_spec=pltpu.PrefetchScalarGridSpec(
            num_scalar_prefetch=0,
            grid=grid,
            in_specs=[
                pl.BlockSpec((tm, tn), lambda i, k: (i, k)),    # x chunk (f32)
                pl.BlockSpec((tn, h0), lambda i, k: (k, 0)),    # W1 K-chunk
                pl.BlockSpec((1, h0), lambda i, k: (0, 0)),     # b1
                pl.BlockSpec((h0, h1), lambda i, k: (0, 0)),    # W2 (small, resident)
                pl.BlockSpec((1, h1), lambda i, k: (0, 0)),     # b2
                pl.BlockSpec((h1, h0), lambda i, k: (0, 0)),    # W3 (small, resident)
                pl.BlockSpec((1, h0), lambda i, k: (0, 0)),     # b3
            ],
            out_specs=pl.BlockSpec((tm, h0), lambda i, k: (i, 0)),
            scratch_shapes=[pltpu.VMEM((tm, h0), jnp.float32)],  # layer-1 acc
        ),
        compiler_params=pltpu.CompilerParams(
            dimension_semantics=("parallel", "arbitrary"),
            vmem_limit_bytes=vmem_limit,
        ),
        cost_estimate=pl.CostEstimate(flops=flops_a, transcendentals=0,
                                      bytes_accessed=bytes_a),
    )(x_p, w1, b1, w2, b2, w3, b3)

    # ------------------ kernel B: final Linear + Sigmoid ------------------
    flops_b = 2 * B_pad * h0 * N_pad
    bytes_b = (2 * B_pad * h0 + 2 * w4.size + 4 * b4.size
               + B_pad * N_pad * jnp.dtype(out_dtype).itemsize)
    out = pl.pallas_call(
        functools.partial(_decoder_kernel, bf16_eup=_has_bf16_eup()),
        out_shape=jax.ShapeDtypeStruct((B_pad, N_pad), out_dtype),
        grid_spec=pltpu.PrefetchScalarGridSpec(
            num_scalar_prefetch=0,
            grid=grid,
            in_specs=[
                pl.BlockSpec((tm, h0), lambda i, j: (i, 0)),    # hidden batch tile
                pl.BlockSpec((h0, tn), lambda i, j: (0, j)),    # W4 column tile
                pl.BlockSpec((1, tn), lambda i, j: (0, j)),     # b4 column tile
            ],
            out_specs=pl.BlockSpec((tm, tn), lambda i, j: (i, j)),
        ),
        compiler_params=pltpu.CompilerParams(
            dimension_semantics=("parallel", "parallel"),
            vmem_limit_bytes=vmem_limit,
        ),
        cost_estimate=pl.CostEstimate(flops=flops_b,
                                      transcendentals=B_pad * N_pad,
                                      bytes_accessed=bytes_b),
    )(h, w4, b4)

    if (B_pad, N_pad) != (B, N):
        out = out[:B, :N]
    return out


def init_params(key, num_items, hidden_dims):
    """Deterministic synthetic parameters (PyTorch Linear shapes, pre-transposed).
    Weights stored in bf16 (MXU inputs); biases in f32."""
    h0, h1 = hidden_dims
    k1, k2, k3, k4 = jax.random.split(key, 4)

    def linear(k, fan_in, fan_out):
        kw, kb = jax.random.split(k)
        w = (jax.random.normal(kw, (fan_in, fan_out), jnp.float32) * 0.1
             ).astype(jnp.bfloat16)
        b = jax.random.normal(kb, (1, fan_out), jnp.float32) * 0.02
        return w, b

    w1, b1 = linear(k1, num_items, h0)   # encoder Linear(num_items, h0)
    w2, b2 = linear(k2, h0, h1)          # encoder Linear(h0, h1)
    w3, b3 = linear(k3, h1, h0)          # decoder Linear(h1, h0)
    w4, b4 = linear(k4, h0, num_items)   # decoder Linear(h0, num_items)
    return dict(w1=w1, b1=b1, w2=w2, b2=b2, w3=w3, b3=b3, w4=w4, b4=b4)


def reference_forward(x, p):
    """Pure-JAX reference mirroring the kernels' bf16-input / f32-accumulate math."""
    h = jnp.dot(x.astype(jnp.bfloat16), p["w1"].astype(jnp.bfloat16),
                preferred_element_type=jnp.float32) + p["b1"]
    h = jnp.maximum(h, 0.0).astype(jnp.bfloat16)
    h = jnp.dot(h, p["w2"].astype(jnp.bfloat16),
                preferred_element_type=jnp.float32) + p["b2"]
    h = jnp.maximum(h, 0.0).astype(jnp.bfloat16)
    h = jnp.dot(h, p["w3"].astype(jnp.bfloat16),
                preferred_element_type=jnp.float32) + p["b3"]
    h = jnp.maximum(h, 0.0).astype(jnp.bfloat16)
    logits = jnp.dot(h, p["w4"].astype(jnp.bfloat16),
                     preferred_element_type=jnp.float32) + p["b4"]
    return jax.nn.sigmoid(logits)


if __name__ == "__main__":
    key = jax.random.PRNGKey(0)
    # Small shapes consistent with MultiVAE (num_items >> hidden dims).
    num_items = 512
    hidden_dims = [128, 256]     # scaled stand-in for the default [200, 600]
    batch = 200                  # deliberately not tile-aligned (exercises padding)

    k_x, k_p = jax.random.split(key)
    # Implicit-feedback rows, L2-normalized like the usual MultiVAE input.
    x_bin = (jax.random.uniform(k_x, (batch, num_items)) < 0.1).astype(jnp.float32)
    x = x_bin / jnp.maximum(jnp.linalg.norm(x_bin, axis=1, keepdims=True), 1e-6)
    params = init_params(k_p, num_items, hidden_dims)

    # Small tiles so the test exercises multiple grid steps on both axes;
    # production defaults are batch_tile=512 / item_tile=1024.
    out = multivae_forward(x, params, batch_tile=128, item_tile=256)
    out = jax.block_until_ready(out)
    assert out.shape == (batch, num_items) and out.dtype == jnp.bfloat16

    ref = reference_forward(x, params)
    err = float(jnp.max(jnp.abs(out.astype(jnp.float32) - ref)))
    assert err < 1.5e-2, f"bf16 output mismatch vs reference (max abs err={err})"

    # f32 output path, default (large) tiles.
    out32 = multivae_forward(x, params, out_dtype=jnp.float32)
    out32 = jax.block_until_ready(out32)
    err32 = float(jnp.max(jnp.abs(out32 - ref)))
    assert err32 < 8e-3, f"f32 output mismatch vs reference (max abs err={err32})"

    print("KERNEL_OK")
</pallas_src>

<mosaic_0001>
module attributes {stable_mosaic.version = 11 : i64} {
  func.func @_encoder_kernel(%arg0: i32, %arg1: i32, %arg2: memref<128x256xf32, #tpu.memory_space<vmem>>, %arg3: memref<256x128xbf16, #tpu.memory_space<vmem>>, %arg4: memref<1x128xf32, #tpu.memory_space<vmem>>, %arg5: memref<128x256xbf16, #tpu.memory_space<vmem>>, %arg6: memref<1x256xf32, #tpu.memory_space<vmem>>, %arg7: memref<256x128xbf16, #tpu.memory_space<vmem>>, %arg8: memref<1x128xf32, #tpu.memory_space<vmem>>, %arg9: memref<128x128xbf16, #tpu.memory_space<vmem>>, %arg10: memref<128x128xf32, #tpu.memory_space<vmem>>) attributes {dimension_semantics = [#tpu.dimension_semantics<parallel>, #tpu.dimension_semantics<arbitrary>], iteration_bounds = array<i64: 2, 2>, scalar_prefetch = 0 : i64, scratch_operands = 1 : i64, tpu.core_type = #tpu.core_type<tc>, window_params = [{transform_indices = @transform_0, window_bounds = array<i64: 128, 256>}, {transform_indices = @transform_1, window_bounds = array<i64: 256, 128>}, {pipeline_mode = #tpu.pipeline_mode<synchronous>, transform_indices = @transform_2, window_bounds = array<i64: 1, 128>}, {pipeline_mode = #tpu.pipeline_mode<synchronous>, transform_indices = @transform_3, window_bounds = array<i64: 128, 256>}, {pipeline_mode = #tpu.pipeline_mode<synchronous>, transform_indices = @transform_4, window_bounds = array<i64: 1, 256>}, {pipeline_mode = #tpu.pipeline_mode<synchronous>, transform_indices = @transform_5, window_bounds = array<i64: 256, 128>}, {pipeline_mode = #tpu.pipeline_mode<synchronous>, transform_indices = @transform_6, window_bounds = array<i64: 1, 128>}, {transform_indices = @transform_7, window_bounds = array<i64: 128, 128>}]} {
    %c0_i32 = arith.constant 0 : i32
    %0 = arith.cmpi eq, %arg1, %c0_i32 : i32
    %1 = arith.extui %0 : i1 to i32
    %c0_i32_0 = arith.constant 0 : i32
    %2 = arith.cmpi ne, %1, %c0_i32_0 : i32
    scf.if %2 {
      %cst_9 = arith.constant 0.000000e+00 : f32
      %13 = vector.broadcast %cst_9 : f32 to vector<128x128xf32>
      %c0_10 = arith.constant 0 : index
      %c0_11 = arith.constant 0 : index
      %14 = vector.load %arg10[%c0_10, %c0_11] : memref<128x128xf32, #tpu.memory_space<vmem>>, vector<128x128xf32>
      tpu.vector_store %arg10[%c0_10, %c0_11], %13 {strides = array<i32>} : memref<128x128xf32, #tpu.memory_space<vmem>>, vector<128x128xf32>,
    } else {
    }
    %c0 = arith.constant 0 : index
    %c0_1 = arith.constant 0 : index
    %3 = vector.load %arg10[%c0, %c0_1] : memref<128x128xf32, #tpu.memory_space<vmem>>, vector<128x128xf32>
    %c0_2 = arith.constant 0 : index
    %c0_3 = arith.constant 0 : index
    %4 = vector.load %arg2[%c0_2, %c0_3] : memref<128x256xf32, #tpu.memory_space<vmem>>, vector<128x256xf32>
    %5 = arith.truncf %4 : vector<128x256xf32> to vector<128x256xbf16>
    %c0_4 = arith.constant 0 : index
    %c0_5 = arith.constant 0 : index
    %6 = vector.load %arg3[%c0_4, %c0_5] : memref<256x128xbf16, #tpu.memory_space<vmem>>, vector<256x128xbf16>
    %cst = arith.constant dense<0.000000e+00> : vector<128x128xf32>
    %7 = tpu.matmul %5, %6, %cst {dimension_numbers = #tpu.dot_dimension_numbers<[1], [0], [0], [1], [0, 0, 1, 1], [], []>} : vector<128x256xbf16>, vector<256x128xbf16>, vector<128x128xf32> -> vector<128x128xf32>
    %8 = arith.addf %3, %7 : vector<128x128xf32>
    %c0_6 = arith.constant 0 : index
    %c0_7 = arith.constant 0 : index
    %9 = vector.load %arg10[%c0_6, %c0_7] : memref<128x128xf32, #tpu.memory_space<vmem>>, vector<128x128xf32>
    tpu.vector_store %arg10[%c0_6, %c0_7], %8 {strides = array<i32>} : memref<128x128xf32, #tpu.memory_space<vmem>>, vector<128x128xf32>,
    %c1_i32 = arith.constant 1 : i32
    %10 = arith.cmpi eq, %arg1, %c1_i32 : i32
    %11 = arith.extui %10 : i1 to i32
    %c0_i32_8 = arith.constant 0 : i32
    %12 = arith.cmpi ne, %11, %c0_i32_8 : i32
    scf.if %12 {
      %c0_9 = arith.constant 0 : index
      %c0_10 = arith.constant 0 : index
      %13 = vector.load %arg10[%c0_9, %c0_10] : memref<128x128xf32, #tpu.memory_space<vmem>>, vector<128x128xf32>
      %c0_11 = arith.constant 0 : index
      %c0_12 = arith.constant 0 : index
      %14 = vector.load %arg4[%c0_11, %c0_12] : memref<1x128xf32, #tpu.memory_space<vmem>>, vector<1x128xf32>
      %15 = vector.broadcast %14 : vector<1x128xf32> to vector<128x128xf32>
      %16 = arith.addf %13, %15 : vector<128x128xf32>
      %cst_13 = arith.constant 0.000000e+00 : f32
      %17 = vector.broadcast %cst_13 : f32 to vector<128x128xf32>
      %18 = arith.maximumf %16, %17 : vector<128x128xf32>
      %19 = arith.truncf %18 : vector<128x128xf32> to vector<128x128xbf16>
      %c0_14 = arith.constant 0 : index
      %c0_15 = arith.constant 0 : index
      %20 = vector.load %arg5[%c0_14, %c0_15] : memref<128x256xbf16, #tpu.memory_space<vmem>>, vector<128x256xbf16>
      %cst_16 = arith.constant dense<0.000000e+00> : vector<128x256xf32>
      %21 = tpu.matmul %19, %20, %cst_16 {dimension_numbers = #tpu.dot_dimension_numbers<[1], [0], [0], [1], [0, 0, 1, 1], [], []>} : vector<128x128xbf16>, vector<128x256xbf16>, vector<128x256xf32> -> vector<128x256xf32>
      %c0_17 = arith.constant 0 : index
      %c0_18 = arith.constant 0 : index
      %22 = vector.load %arg6[%c0_17, %c0_18] : memref<1x256xf32, #tpu.memory_space<vmem>>, vector<1x256xf32>
      %23 = vector.broadcast %22 : vector<1x256xf32> to vector<128x256xf32>
      %24 = arith.addf %21, %23 : vector<128x256xf32>
      %cst_19 = arith.constant 0.000000e+00 : f32
      %25 = vector.broadcast %cst_19 : f32 to vector<128x256xf32>
      %26 = arith.maximumf %24, %25 : vector<128x256xf32>
      %27 = arith.truncf %26 : vector<128x256xf32> to vector<128x256xbf16>
      %c0_20 = arith.constant 0 : index
      %c0_21 = arith.constant 0 : index
      %28 = vector.load %arg7[%c0_20, %c0_21] : memref<256x128xbf16, #tpu.memory_space<vmem>>, vector<256x128xbf16>
      %cst_22 = arith.constant dense<0.000000e+00> : vector<128x128xf32>
      %29 = tpu.matmul %27, %28, %cst_22 {dimension_numbers = #tpu.dot_dimension_numbers<[1], [0], [0], [1], [0, 0, 1, 1], [], []>} : vector<128x256xbf16>, vector<256x128xbf16>, vector<128x128xf32> -> vector<128x128xf32>
      %c0_23 = arith.constant 0 : index
      %c0_24 = arith.constant 0 : index
      %30 = vector.load %arg8[%c0_23, %c0_24] : memref<1x128xf32, #tpu.memory_space<vmem>>, vector<1x128xf32>
      %31 = vector.broadcast %30 : vector<1x128xf32> to vector<128x128xf32>
      %32 = arith.addf %29, %31 : vector<128x128xf32>
      %cst_25 = arith.constant 0.000000e+00 : f32
      %33 = vector.broadcast %cst_25 : f32 to vector<128x128xf32>
      %34 = arith.maximumf %32, %33 : vector<128x128xf32>
      %35 = arith.truncf %34 : vector<128x128xf32> to vector<128x128xbf16>
      %c0_26 = arith.constant 0 : index
      %c0_27 = arith.constant 0 : index
      %36 = vector.load %arg9[%c0_26, %c0_27] : memref<128x128xbf16, #tpu.memory_space<vmem>>, vector<128x128xbf16>
      tpu.vector_store %arg9[%c0_26, %c0_27], %35 {strides = array<i32>} : memref<128x128xbf16, #tpu.memory_space<vmem>>, vector<128x128xbf16>,
    } else {
    }
    return
  }
  func.func @transform_0(%arg0: i32, %arg1: i32) -> (i32, i32) {
    %c0_i32 = arith.constant 0 : i32
    return %arg0, %arg1 : i32, i32
  }
  func.func @transform_1(%arg0: i32, %arg1: i32) -> (i32, i32) {
    %c0_i32 = arith.constant 0 : i32
    %c0_i32_0 = arith.constant 0 : i32
    return %arg1, %c0_i32 : i32, i32
  }
  func.func @transform_2(%arg0: i32, %arg1: i32) -> (i32, i32) {
    %c0_i32 = arith.constant 0 : i32
    %c0_i32_0 = arith.constant 0 : i32
    %c0_i32_1 = arith.constant 0 : i32
    return %c0_i32, %c0_i32_0 : i32, i32
  }
  func.func @transform_3(%arg0: i32, %arg1: i32) -> (i32, i32) {
    %c0_i32 = arith.constant 0 : i32
    %c0_i32_0 = arith.constant 0 : i32
    %c0_i32_1 = arith.constant 0 : i32
    return %c0_i32, %c0_i32_0 : i32, i32
  }
  func.func @transform_4(%arg0: i32, %arg1: i32) -> (i32, i32) {
    %c0_i32 = arith.constant 0 : i32
    %c0_i32_0 = arith.constant 0 : i32
    %c0_i32_1 = arith.constant 0 : i32
    return %c0_i32, %c0_i32_0 : i32, i32
  }
  func.func @transform_5(%arg0: i32, %arg1: i32) -> (i32, i32) {
    %c0_i32 = arith.constant 0 : i32
    %c0_i32_0 = arith.constant 0 : i32
    %c0_i32_1 = arith.constant 0 : i32
    return %c0_i32, %c0_i32_0 : i32, i32
  }
  func.func @transform_6(%arg0: i32, %arg1: i32) -> (i32, i32) {
    %c0_i32 = arith.constant 0 : i32
    %c0_i32_0 = arith.constant 0 : i32
    %c0_i32_1 = arith.constant 0 : i32
    return %c0_i32, %c0_i32_0 : i32, i32
  }
  func.func @transform_7(%arg0: i32, %arg1: i32) -> (i32, i32) {
    %c0_i32 = arith.constant 0 : i32
    %c0_i32_0 = arith.constant 0 : i32
    return %arg0, %c0_i32 : i32, i32
  }
}

</mosaic_0001>

<bundles_post_ra>
// kernel: tpu_custom_call.1
= control target key start
LH: loop header
LB: loop body
LE: loop exit
PB: predicated region body
PF: predicated region fallthrough
CT: control target
= control target key end

     0   :  { %s2858_s0 = inlined_call_operand.hbm [shape: f32[256,512], index: 0, kind: input, shape index: {}]   ;;  %s2859_s1 = inlined_call_operand.hbm [shape: bf16[512,128], index: 1, kind: input, shape index: {}]   ;;  %s2860_s2 = inlined_call_operand.vmem [shape: f32[1,128], index: 2, kind: input, shape index: {}]   ;;  %s2861_s3 = inlined_call_operand.hbm [shape: bf16[128,256], index: 3, kind: input, shape index: {}]   ;;  %s2862_s4 = inlined_call_operand.vmem [shape: f32[1,256], index: 4, kind: input, shape index: {}]   ;;  %s2863_s5 = inlined_call_operand.hbm [shape: bf16[256,128], index: 5, kind: input, shape index: {}]   ;;  %s2864_s6 = inlined_call_operand.vmem [shape: f32[1,128], index: 6, kind: input, shape index: {}]   ;;  %s2865_s7 = inlined_call_operand.hbm [shape: bf16[256,128], index: 7, kind: output, shape index: {}]  }
   0x1   :  { %2883 = sst [smem:[#allocation27_spill]] %s2858_s0 }
   0x2   :  { %2884 = sst [smem:[#allocation28_spill]] %s2860_s2 }
   0x3   :  { %2885 = sst [smem:[#allocation29_spill]] %s2861_s3 }
   0x4   :  { %2886 = sst [smem:[#allocation30_spill]] %s2862_s4 }
   0x5   :  { %2887 = sst [smem:[#allocation31_spill]] %s2863_s5 }
   0x6   :  { %2888 = sst [smem:[#allocation32_spill]] %s2864_s6 }
   0x7   :  { %2889 = sst [smem:[#allocation33_spill]] %s2865_s7 }
   0x8   :  { %12 = vsyncpa [#allocation4], 0 }
   0x9   :  { %14 = vsyncpa [#allocation4 + $0x1], 0 }
   0xa   :  { %15 = vsyncpa [#allocation7], 0 }
   0xb   :  { %17 = vsyncpa [#allocation7 + $0x1], 0 }
   0xc   :  { %18 = vsyncpa [#allocation10], 0 }
   0xd   :  { %19 = vsyncpa [#allocation5], 0 }
   0xe   :  { %21 = vsyncpa [#allocation5 + $0x1], 0  ;;  %s2380_s24 = smov 0   ;;  %s2382_s25 = smov 0  }
   0xf   :  { %s2384_s26 = smov 0   ;;  %s2386_s27 = smov 0  }
  0x10   :  { %s2388_s28 = smov 0   ;;  %s2390_s29 = smov 0  }
  0x11   :  { %s2392_s30 = smov 0   ;;  %s2394_s8 = smov 0  }
  0x12   :  { %s2396_s9 = smov 0   ;;  %s2398_s10 = smov 0  }
  0x13   :  { %s2400_s11 = smov 0   ;;  %s2402_s12 = smov 0  }
  0x14   :  { %s2404_s13 = smov 0   ;;  %s2406_s14 = smov 0  }
  0x15 LB: > { %2890 = sst [smem:[#allocation17_spill]] %s2270_s24  ;;  %s2447_s15 = sadd.s32 4294967295, %s2322_s14   ;;  %s2322_s14 = sphi %s2406_s14, %s27_s14   ;;  %s2318_s13 = sphi %s2404_s13, %s2939_s13   ;;  %s2314_s12 = sphi %s2402_s12, %s2950_s12   ;;  %s2310_s11 = sphi %s2400_s11, %s2949_s11   ;;  %s2306_s10 = sphi %s2398_s10, %s2948_s10   ;;  %s2302_s9 = sphi %s2396_s9, %s2947_s9   ;;  %s2298_s8 = sphi %s2394_s8, %s2946_s8   ;;  %s2294_s30 = sphi %s2392_s30, %s2945_s30   ;;  %s2290_s29 = sphi %s2390_s29, %s2944_s29   ;;  %s2286_s28 = sphi %s2388_s28, %s2943_s28   ;;  %s2282_s27 = sphi %s2386_s27, %s2942_s27   ;;  %s2278_s26 = sphi %s2384_s26, %s2941_s26   ;;  %s2274_s25 = sphi %s2382_s25, %s2940_s25   ;;  %s2270_s24 = sphi %s2380_s24, %s2936_s24  }
  0x16   : > { %2891 = sst [smem:[#allocation18_spill]] %s2274_s25  ;;  %s1537_s16 = sadd.s32 4294967294, %s2322_s14  }
  0x17   : > { %2892 = sst [smem:[#allocation19_spill]] %s2306_s10  ;;  %p61_p0 = scmp.ne.s32.totalorder %s2298_s8, %s2294_s30 }
  0x18   : > { %2893 = sst [smem:[#allocation20_spill]] %s2310_s11  ;;  %p2871_p1 = scmp.eq.s32.totalorder %s2447_s15, 0 }
  0x19   : > { %2894 = sst [smem:[#allocation21_spill]] %s2318_s13  ;;  %p87_p2 = scmp.ne.s32.totalorder %s2286_s28, %s2282_s27 }
  0x1a   : > { %p2456_p3 = por %p2871_p1, %p61_p0  ;;  %p215_p4 = scmp.ne.s32.totalorder %s2278_s26, %s2274_s25 }
  0x1b   : > { %p2464_p5 = por %p87_p2, %p2871_p1  ;;  %p216_p6 = scmp.eq.s32.totalorder %s2447_s15, 3 }
  0x1c   : > { %p221_p7 = scmp.ne.s32.totalorder %s2274_s25, %s2270_s24  ;;  %p222_p8 = scmp.eq.s32.totalorder %s1537_s16, 3 }
  0x1d   : > { %s2896_s19 = scalar_select %p2464_p5, 1, 0 }
  0x1e   : > { %p2471_p9 = por %p216_p6, %p215_p4  ;;  %p1538_p10 = scmp.ge.s32.totalorder %s2322_s14, 1 }
  0x1f   : > { %2897 = sst [smem:[#allocation22_spill]] %s2896_s19  ;;  %p2476_p11 = por %p222_p8, %p221_p7 }
  0x20   : > { %s2898_s20 = scalar_select %p2471_p9, 1, 0 }
  0x21   : > { %s2900_s21 = scalar_select %p2476_p11, 1, 0 }
  0x22   : > { %2899 = sst [smem:[#allocation23_spill]] %s2898_s20  ;;  %p229_p12 = scmp.lt.s32.totalorder %s2322_s14, 5 }
  0x23   : > { %2901 = sst [smem:[#allocation24_spill]] %s2900_s21  ;;  %s2324_s23 = smov [#allocation8]  }
  0x24   : > { %p2481_p13 = pnand %p1538_p10, %p229_p12  ;;  %s244_s27 = sshll.u32 %s2324_s23, 4  ;;  %s245_s27 = int_to_ptr.vmem [resolvable:$true] %s244_s27 }
  0x25   : > { %s2325_s16 = smov [#allocation9]   ;;  %s2069_s21 = scalar_lea.vmem %s245_s27, 2048 }
  0x26   : > { %p1853_p0 = pneg %p2481_p13  ;;  %s260_s17 = sshll.u32 %s2325_s16, 4  ;;  %s261_s17 = int_to_ptr.vmem [resolvable:$true] %s260_s17 }
  0x27   : > { %p2070_p6 = scmp.ne.s32.totalorder %s245_s27, %s2069_s21  ;;  %p2077_p10 = scmp.lt.s32.totalorder %s245_s27, %s245_s27 }
  0x28   : > { %p2489_p2 = pnand %p1853_p0, %p2871_p1  ;;  %p2078_p12 = scmp.lt.s32.totalorder %s2069_s21, %s2069_s21 }
  0x2a   : > { %p2060_p4 = pneg %p2489_p2  ;;  %p2079_p11 = por %p2078_p12, %p2077_p10 }
  0x2c   : > { %p2072_p7 = pnand %p2070_p6, %p2060_p4 }
  0x2e   : > { %p2073_p8 = pneg %p2072_p7 }
  0x30   : > { %p2080_p0 = pnand %p2079_p11, %p2073_p8 }
  0x32   : > { %2083 = shalt.err (!%p2080_p0)
}
  0x33   : > { %s2326_s23 = smov 128   ;;  %s2327_s24 = smov 8  }
  0x34   : > { %s2904_s3 = sld [smem:[#allocation29_spill]]  ;;  %s2095_s20 = scalar_lea.vmem %s261_s17, 2048 }
  0x35   : > { %p2096_p1 = scmp.ne.s32.totalorder %s261_s17, %s2095_s20  ;;  %p2103_p9 = scmp.lt.s32.totalorder %s261_s17, %s261_s17 }
  0x36   : > { %p2104_p5 = scmp.lt.s32.totalorder %s2095_s20, %s2095_s20 }
  0x37   : > { %p2098_p6 = pnand %p2096_p1, %p2060_p4 }
  0x38   : > { %p2105_p10 = por %p2104_p5, %p2103_p9 }
  0x39   : > { %p2099_p7 = pneg %p2098_p6 }
  0x3a   : > { %1856 = dma.hbm_to_vmem [thread:$0]  (!%p2489_p2), %s2904_s3, 2048, %s245_s27, [#allocation7], %s2326_s23, %s2326_s23, %s2327_s24  }
  0x3b   : > { %p2106_p11 = pnand %p2105_p10, %p2099_p7 }
  0x3d   : > { %2109 = shalt.err (!%p2106_p11)
}
  0x3e   : > { %s2874_s21 = smov 64   ;;  %s2875_s7 = smov 4  }
  0x3f   : > { %s2905_s5 = sld [smem:[#allocation31_spill]]  ;;  %s36_s27 = sadd.s32 1, %s2314_s12 }
  0x40   : > { %s39_s23 = sadd.s32 1, %s2318_s13  ;;  %p37_p1 = scmp.ge.s32.totalorder %s36_s27, 2 }
  0x41   : > { %s48_s16 = sadd.s32 1, %s2302_s9  ;;  %p55_p5 = scmp.ne.s32.totalorder %s2302_s9, %s2298_s8 }
  0x42   : > { %p56_p9 = scmp.eq.s32.totalorder %s2322_s14, 0  ;;  %s2952_s27 = smov (%p37_p1, %s36_s27), 0 }
  0x43   : > { %2906 = sst [smem:[#allocation25_spill]] %s2952_s27  ;;  %s2954_s23 = smov (!%p37_p1, %s39_s23), %s2318_s13 }
  0x44   : > { %s2525_s30 = ssub.s32 %s2314_s12, %s2952_s27  ;;  %p41_p4 = scmp.ge.s32.totalorder %s2954_s23, 2 }
  0x45   : > { %1859 = dma.hbm_to_vmem [thread:$0]  (!%p2489_p2), %s2905_s5, 2048, %s261_s17, [#allocation10], %s2874_s21, %s2874_s21, %s2875_s7  }
  0x46   : > { %p2529_p2 = por %p56_p9, %p55_p5  ;;  %p72_p8 = scmp.eq.s32.totalorder %s2525_s30, 0 }
  0x47   : > { %p1873_p12 = scmp.lt.s32.totalorder %s2322_s14, 4  ;;  %s277_s24 = sand.u32 1, %s2302_s9  }
  0x48   : > { %s2956_s23 = smov (%p41_p4, %s2954_s23), 0  ;;  %s1542_s20 = sshll.u32 %s277_s24, 8 }
  0x49   : > { %2908 = sst [smem:[#allocation26_spill]] %s2956_s23  ;;  %s43_s21 = ssub.s32 %s2318_s13, %s2956_s23 }
  0x4a   : > { %s45_s7 = sor.u32 %s2525_s30, %s43_s21  ;;  %p203_p0 = scmp.eq.s32.totalorder %s43_s21, 0 }
  0x4b   : > { %p46_p6 = scmp.eq.s32.totalorder %s45_s7, 0  ;;  %s1544_s3 = sshll.u32 %s2314_s12, 1 }
  0x4c   : > { %s2909_s5 = sadd.s32 1, %s2278_s26  ;;  %s1629_s6 = sshll.u32 %s2318_s13, 6 }
  0x4d   : > { %s2545_s27 = scalar_select %p203_p0, %s2278_s26, %s2909_s5  }
  0x4e   : > { %s2548_s11 = scalar_select %p46_p6, %s2302_s9, %s48_s16  }
  0x4f   : > { %s281_s4 = scalar_lea.vmem [#allocation3], %s1542_s20  ;;  %s288_s10 = sadd.s32 %s1629_s6, %s1544_s3 }
  0x50   : > { %s291_s2 = sshll.u32 %s281_s4, 4  ;;  %s1546_s25 = sshll.u32 %s288_s10, 7  ;;  %s292_s2 = int_to_ptr.vmem [resolvable:$true] %s291_s2 }
  0x51   : > { %p2555_p7 = pnand %p1873_p12, %p2529_p2  ;;  %s2911_s0 = sld [smem:[#allocation27_spill]] }
  0x52   : > { %s278_s23 = scalar_lea.sflag [#allocation4], %s277_s24  ;;  %s2123_s16 = scalar_lea.vmem %s292_s2, 4096 }
  0x53   : > { %p2112_p10 = pneg %p2555_p7  ;;  %p2124_p11 = scmp.ne.s32.totalorder %s292_s2, %s2123_s16 }
  0x54   : > { %s2330_s3 = smov [#allocation3]  }
  0x55   : > { %p2126_p1 = pnand %p2124_p11, %p2112_p10  ;;  %s2128_s4 = sshll.u32 %s2330_s3, 4  ;;  %s2129_s4 = int_to_ptr.vmem [resolvable:$false] %s2128_s4 }
  0x56   : > { %s2130_s6 = scalar_lea.vmem %s2129_s4, 8192  ;;  %p2131_p2 = scmp.lt.s32.totalorder %s292_s2, %s2129_s4 }
  0x57   : > { %s290_s5 = scalar_lea.hbm %s2911_s0, %s1546_s25  ;;  %p2127_p5 = pneg %p2126_p1 }
  0x58   : > { %p2132_p4 = scmp.lt.s32.totalorder %s2130_s6, %s2123_s16 }
  0x5a   : > { %p2133_p0 = por %p2132_p4, %p2131_p2 }
  0x5c   : > { %p2134_p6 = pnand %p2133_p0, %p2127_p5 }
  0x5e   : > { %2137 = shalt.err (!%p2134_p6)
}
  0x5f   : > { %s2331_s10 = smov 512   ;;  %s2332_s25 = smov 256  }
  0x60   : > { %s2333_s17 = smov 16   ;;  %s301_s24 = sand.u32 1, %s2322_s14  }
  0x61   : > { %1863 = dma.hbm_to_vmem [thread:$0]  (!%p2555_p7), %s290_s5, 4096, %s292_s2, %s278_s23, %s2331_s10, %s2332_s25, %s2333_s17  }
  0x62   : > { %s74_s20 = sadd.s32 1, %s2290_s29  ;;  %p81_p10 = scmp.ne.s32.totalorder %s2290_s29, %s2286_s28 }
  0x63   : > { %s2573_s21 = scalar_select %p72_p8, %s2290_s29, %s74_s20  }
  0x64   : > { %p83_p11 = por %p81_p10, %p56_p9  ;;  %s303_s7 = sand.u32 1, %s2290_s29  }
  0x65   : > { %s1630_s16 = sshll.u32 %s2314_s12, 11  ;;  %s1547_s3 = sshll.u32 %s303_s7, 7 }
  0x66   : > { %s311_s0 = scalar_lea.hbm %s2859_s1, %s1630_s16  ;;  %p2584_p1 = pnand %p1873_p12, %p83_p11 }
  0x67   : > { %s305_s2 = scalar_lea.vmem [#allocation6], %s1547_s3  ;;  %s302_s23 = scalar_lea.sflag [#allocation7], %s301_s24 }
  0x68   : > { %s312_s19 = sshll.u32 %s305_s2, 4  ;;  %p2140_p8 = pneg %p2584_p1  ;;  %s313_s19 = int_to_ptr.vmem [resolvable:$true] %s312_s19 }
  0x69   : > { %s2151_s30 = scalar_lea.vmem %s313_s19, 2048  ;;  %s2334_s5 = smov [#allocation6]  }
  0x6a   : > { %p2152_p9 = scmp.ne.s32.totalorder %s313_s19, %s2151_s30  ;;  %s2156_s10 = sshll.u32 %s2334_s5, 4  ;;  %s2157_s10 = int_to_ptr.vmem [resolvable:$false] %s2156_s10 }
  0x6b   : > { %s2158_s25 = scalar_lea.vmem %s2157_s10, 4096  ;;  %p2159_p2 = scmp.lt.s32.totalorder %s313_s19, %s2157_s10 }
  0x6c   : > { %p2154_p7 = pnand %p2152_p9, %p2140_p8  ;;  %p2160_p12 = scmp.lt.s32.totalorder %s2158_s25, %s2151_s30 }
  0x6e   : > { %p2155_p5 = pneg %p2154_p7  ;;  %p2161_p4 = por %p2160_p12, %p2159_p2 }
  0x70   : > { %p2162_p0 = pnand %p2161_p4, %p2155_p5 }
  0x72   : > { %2165 = shalt.err (!%p2162_p0)
}
  0x73   : > { %s2913_s17 = smov 4   ;;  %s2914_s20 = smov 64  }
  0x74   : > { %1866 = dma.hbm_to_vmem [thread:$0]  (!%p2584_p1), %s311_s0, 2048, %s313_s19, %s302_s23, %s2914_s20, %s2914_s20, %s2913_s17  }
  0x75   : > { %324 = sbr.rel (%p2481_p13) target bundleno = 953 (0x3b9), region = 48  ;;  %s326_s24 = sand.u32 (!%p2481_p13), 1, %s2298_s8  }
  0x76   : > { %s1551_s7 = sshll.u32 (!%p2481_p13), %s326_s24, 8  ;;  %s327_s16 = scalar_lea.sflag (!%p2481_p13), [#allocation4], %s326_s24 }
  0x77   : > { %s2598_s3 = scalar_lea.vmem (!%p2481_p13), [#allocation3], %s1551_s7 }
  0x7a   : > { %2249 = dma.done.wait (%p2456_p3), %s327_s16, 4096  }
  0x7b   : > { %2251 = vsyncadd (%p2456_p3), %s327_s16, 4294963200  ;;  %s2915_s13 = sld [smem:[#allocation22_spill]]  ;;  %s335_s4 = sand.u32 1, %s2447_s15  }
  0x7c   : > { %s337_s0 = sand.u32 1, %s2286_s28   ;;  %s336_s22 = scalar_lea.sflag [#allocation7], %s335_s4 }
  0x7d   : > { %s1552_s6 = sshll.u32 %s337_s0, 7 }
  0x7e   : > { %s2606_s2 = scalar_lea.vmem [#allocation6], %s1552_s6 }
  0x81   : > { %p2916_p13 = scmp.ne.s32.totalorder %s2915_s13, 0 }
  0x83   : > { %2253 = dma.done.wait (%p2916_p13), %s336_s22, 2048  }
  0x84   : > { %2255 = vsyncadd (%p2916_p13), %s336_s22, 4294965248  ;;  %p2917_p6 = scmp.eq.s32.totalorder %s2447_s15, 0 }
  0x86   : > { %2257 = dma.done.wait (%p2917_p6), [#allocation7], 2048   ;;  %p2918_p10 = pmov %p2917_p6 }
  0x87   : > { %p2919_p3 = pmov %p2917_p6 }
  0x88   : > { %2259 = vsyncadd (%p2918_p10), [#allocation7], 4294965248 }
  0x89   : > { %2261 = dma.done.wait (%p2919_p3), [#allocation10], 2048   ;;  %p2920_p11 = pmov %p2919_p3 }
  0x8a   : > { %s2921_s18 = sld [smem:[#allocation18_spill]] }
  0x8b   : > { %2263 = vsyncadd (%p2920_p11), [#allocation10], 4294965248  ;;  %s2922_s5 = sld [smem:[#allocation19_spill]] }
  0x90   : > { %s380_s19 = sand.u32 1, %s2921_s18  }
  0x91   : > { %s1555_s23 = sshll.u32 %s380_s19, 6  ;;  %p1556_p1 = scmp.ne.s32.totalorder %s2922_s5, 0 }
  0x92   : > { %s2623_s30 = scalar_lea.vmem [#allocation11], %s1555_s23 }
  0x93   : > { %391 = sbr.rel (%p1556_p1) target bundleno = 161 (0xa1), region = 68 }
  0x98   : > { %v2335_v0 = vmov 0.0  }
  0x99   : > { %392 = vst [vmem:[#allocation2 + $0x30] sm:$0xff] %v2335_v0  ;;  %393 = vst [vmem:[#allocation2] sm:$0xff] %v2335_v0 }
  0x9a   : > { %394 = vst [vmem:[#allocation2 + $0x58] sm:$0xff] %v2335_v0  ;;  %395 = vst [vmem:[#allocation2 + $0x18] sm:$0xff] %v2335_v0 }
  0x9b   : > { %396 = vst [vmem:[#allocation2 + $0x50] sm:$0xff] %v2335_v0  ;;  %397 = vst [vmem:[#allocation2 + $0x68] sm:$0xff] %v2335_v0 }
  0x9c   : > { %398 = vst [vmem:[#allocation2 + $0x8] sm:$0xff] %v2335_v0  ;;  %399 = vst [vmem:[#allocation2 + $0x48] sm:$0xff] %v2335_v0 }
  0x9d   : > { %400 = vst [vmem:[#allocation2 + $0x40] sm:$0xff] %v2335_v0  ;;  %401 = vst [vmem:[#allocation2 + $0x20] sm:$0xff] %v2335_v0 }
  0x9e   : > { %402 = vst [vmem:[#allocation2 + $0x10] sm:$0xff] %v2335_v0  ;;  %403 = vst [vmem:[#allocation2 + $0x38] sm:$0xff] %v2335_v0 }
  0x9f   : > { %404 = vst [vmem:[#allocation2 + $0x60] sm:$0xff] %v2335_v0  ;;  %405 = vst [vmem:[#allocation2 + $0x70] sm:$0xff] %v2335_v0 }
  0xa0   : > { %406 = vst [vmem:[#allocation2 + $0x78] sm:$0xff] %v2335_v0  ;;  %407 = vst [vmem:[#allocation2 + $0x28] sm:$0xff] %v2335_v0 }
  0xa1 PF: > { %v2002_v1 = vld [vmem:[%s2606_s2 + $0x78] sm:$0xff]   ;;  %v2004_v3 = vld [vmem:[%s2606_s2 + $0x70] sm:$0xff]   ;;  %v2006_v5 = vld [vmem:[%s2606_s2 + $0x68] sm:$0xff]   ;;  %s2923_s15 = sld [smem:[#allocation19_spill]] }
  0xa2   : > { %v2003_v2 = vld [vmem:[%s2606_s2 + $0x38] sm:$0xff]   ;;  %1695 = vmatprep.subr.bf16.mxu0 %v2002_v1  ;;  %1823 = vmatprep.subr.bf16.mxu1 %v2002_v1  ;;  %v2005_v4 = vld [vmem:[%s2606_s2 + $0x30] sm:$0xff]   ;;  %v2007_v6 = vld [vmem:[%s2606_s2 + $0x28] sm:$0xff]  }
  0xa3   : > { %1696 = vmatpush3.bf16.msra.mxu0 %v2003_v2  ;;  %1831 = vmatpush3.bf16.msra.mxu1 %v2003_v2  ;;  %v2008_v7 = vld [vmem:[%s2606_s2 + $0x60] sm:$0xff]   ;;  %v2010_v9 = vld [vmem:[%s2606_s2 + $0x58] sm:$0xff]   ;;  %v2012_v11 = vld [vmem:[%s2606_s2 + $0x50] sm:$0xff]  }
  0xa4   : > { %1697 = vmatprep.subr.bf16.mxu0 %v2004_v3  ;;  %1824 = vmatprep.subr.bf16.mxu1 %v2004_v3  ;;  %v2009_v8 = vld [vmem:[%s2606_s2 + $0x20] sm:$0xff]   ;;  %v2011_v10 = vld [vmem:[%s2606_s2 + $0x18] sm:$0xff]   ;;  %v425_v12 = vld [vmem:[%s2598_s3 + $0x8] sm:$0xff] }
  0xa5   : > { %v427_v13 = vld [vmem:[%s2598_s3 + $0x18] sm:$0xff]  ;;  %v441_v14 = vld [vmem:[%s2598_s3 + $0x88] sm:$0xff]  ;;  %v2013_v18 = vld [vmem:[%s2606_s2 + $0x10] sm:$0xff]  }
  0xa6   : > { %v457_v15 = vpack.c.bf16 %v427_v13, %v425_v12  ;;  %v443_v16 = vld [vmem:[%s2598_s3 + $0x98] sm:$0xff]  ;;  %v2014_v19 = vld [vmem:[%s2606_s2 + $0x48] sm:$0xff]   ;;  %v2016_v21 = vld [vmem:[%s2606_s2 + $0x40] sm:$0xff]  }
  0xa7   : > { %1698 = vmatpush3.bf16.msra.mxu0 %v2005_v4  ;;  %1832 = vmatpush3.bf16.msra.mxu1 %v2005_v4  ;;  %v465_v17 = vpack.c.bf16 %v443_v16, %v441_v14  ;;  %v2015_v20 = vld [vmem:[%s2606_s2 + $0x8] sm:$0xff]   ;;  %v2017_v22 = vld [vmem:[%s2606_s2] sm:$0xff]   ;;  %v426_v24 = vld [vmem:[%s2598_s3 + $0x10] sm:$0xff]  ;;  %p1573_p8 = scmp.ne.s32.totalorder %s2923_s15, 1 }
  0xa8   : > { %1699 = vmatprep.subr.bf16.mxu0 %v2006_v5  ;;  %1825 = vmatprep.subr.bf16.mxu1 %v2006_v5  ;;  %v424_v23 = vld [vmem:[%s2598_s3] sm:$0xff]  ;;  %v442_v26 = vld [vmem:[%s2598_s3 + $0x90] sm:$0xff]  ;;  %v429_v27 = vld [vmem:[%s2598_s3 + $0x28] sm:$0xff]  ;;  %s2924_s17 = sld [smem:[#allocation28_spill]] (!%p1573_p8) }
  0xa9   : > { %632 = vmatprep.mubr.bf16.mxu0 %v457_v15  ;;  %664 = vmatprep.mubr.bf16.mxu1 %v465_v17  ;;  %v440_v25 = vld [vmem:[%s2598_s3 + $0x80] sm:$0xff]  ;;  %v431_v28 = vld [vmem:[%s2598_s3 + $0x38] sm:$0xff]  ;;  %v445_v29 = vld [vmem:[%s2598_s3 + $0xa8] sm:$0xff]  ;;  %v456_v31 = vpack.c.bf16 %v426_v24, %v424_v23  ;;  %s2925_s7 = sld [smem:[#allocation30_spill]] (!%p1573_p8) }
  0xaa   : > { %v447_v30 = vld [vmem:[%s2598_s3 + $0xb8] sm:$0xff]  ;;  %v464_v32 = vpack.c.bf16 %v442_v26, %v440_v25  ;;  %v459_v33 = vpack.c.bf16 %v431_v28, %v429_v27  ;;  %v428_v35 = vld [vmem:[%s2598_s3 + $0x20] sm:$0xff]  ;;  %v430_v36 = vld [vmem:[%s2598_s3 + $0x30] sm:$0xff]  ;;  %s2926_s13 = sld [smem:[#allocation32_spill]] (!%p1573_p8) }
  0xab   : > { %1700 = vmatpush3.bf16.msra.mxu0 %v2007_v6  ;;  %1833 = vmatpush3.bf16.msra.mxu1 %v2007_v6  ;;  %v467_v34 = vpack.c.bf16 %v447_v30, %v445_v29  ;;  %v444_v37 = vld [vmem:[%s2598_s3 + $0xa0] sm:$0xff]  ;;  %v446_v38 = vld [vmem:[%s2598_s3 + $0xb0] sm:$0xff]  ;;  %v433_v39 = vld [vmem:[%s2598_s3 + $0x48] sm:$0xff]  ;;  %v458_v43 = vpack.c.bf16 %v430_v36, %v428_v35 }
  0xac   : > { %1701 = vmatprep.subr.bf16.mxu0 %v2008_v7  ;;  %1826 = vmatprep.subr.bf16.mxu1 %v2008_v7  ;;  %v435_v40 = vld [vmem:[%s2598_s3 + $0x58] sm:$0xff]  ;;  %v449_v41 = vld [vmem:[%s2598_s3 + $0xc8] sm:$0xff]  ;;  %v466_v44 = vpack.c.bf16 %v446_v38, %v444_v37  ;;  %v432_v47 = vld [vmem:[%s2598_s3 + $0x40] sm:$0xff] }
  0xad   : > { %v451_v42 = vld [vmem:[%s2598_s3 + $0xd8] sm:$0xff]  ;;  %v461_v45 = vpack.c.bf16 %v435_v40, %v433_v39  ;;  %v434_v48 = vld [vmem:[%s2598_s3 + $0x50] sm:$0xff]  ;;  %v448_v49 = vld [vmem:[%s2598_s3 + $0xc0] sm:$0xff] }
  0xae   : > { %v469_v46 = vpack.c.bf16 %v451_v42, %v449_v41  ;;  %v450_v50 = vld [vmem:[%s2598_s3 + $0xd0] sm:$0xff]  ;;  %v437_v51 = vld [vmem:[%s2598_s3 + $0x68] sm:$0xff]  ;;  %v439_v52 = vld [vmem:[%s2598_s3 + $0x78] sm:$0xff]  ;;  %v460_v55 = vpack.c.bf16 %v434_v48, %v432_v47 }
  0xaf   : > { %1702 = vmatpush3.bf16.msra.mxu0 %v2009_v8  ;;  %1834 = vmatpush3.bf16.msra.mxu1 %v2009_v8  ;;  %v453_v53 = vld [vmem:[%s2598_s3 + $0xe8] sm:$0xff]  ;;  %v455_v54 = vld [vmem:[%s2598_s3 + $0xf8] sm:$0xff]  ;;  %v468_v56 = vpack.c.bf16 %v450_v50, %v448_v49  ;;  %v463_v57 = vpack.c.bf16 %v439_v52, %v437_v51  ;;  %v436_v59 = vld [vmem:[%s2598_s3 + $0x60] sm:$0xff] }
  0xb0   : > { %1703 = vmatprep.subr.bf16.mxu0 %v2010_v9  ;;  %1827 = vmatprep.subr.bf16.mxu1 %v2010_v9  ;;  %v471_v58 = vpack.c.bf16 %v455_v54, %v453_v53  ;;  %v438_v60 = vld [vmem:[%s2598_s3 + $0x70] sm:$0xff]  ;;  %v452_v61 = vld [vmem:[%s2598_s3 + $0xe0] sm:$0xff]  ;;  %v410_v23 = vld [vmem:[#allocation2 + $0x58] sm:$0xff] }
  0xb1   : > { %v454_v62 = vld [vmem:[%s2598_s3 + $0xf0] sm:$0xff]  ;;  %v462_v63 = vpack.c.bf16 %v438_v60, %v436_v59  ;;  %v416_v5 = vld [vmem:[#allocation2 + $0x40] sm:$0xff]  ;;  %v419_v35 = vld [vmem:[#allocation2 + $0x38] sm:$0xff] }
  0xb2   : > { %v470_v0 = vpack.c.bf16 %v454_v62, %v452_v61  ;;  %v408_v3 = vld [vmem:[#allocation2 + $0x30] sm:$0xff]  ;;  %v409_v13 = vld [vmem:[#allocation2] sm:$0xff]  ;;  %v413_v53 = vld [vmem:[#allocation2 + $0x68] sm:$0xff] }
  0xb3   : > { %1704 = vmatpush3.bf16.msra.mxu0 %v2011_v10  ;;  %1835 = vmatpush3.bf16.msra.mxu1 %v2011_v10  ;;  %v417_v15 = vld [vmem:[#allocation2 + $0x20] sm:$0xff]  ;;  %v418_v25 = vld [vmem:[#allocation2 + $0x10] sm:$0xff] }
  0xb4   : > { %1705 = vmatprep.subr.bf16.mxu0 %v2012_v11  ;;  %1828 = vmatprep.subr.bf16.mxu1 %v2012_v11 }
  0xb7   : > { %1706 = vmatpush3.bf16.msra.mxu0 %v2013_v18  ;;  %1836 = vmatpush3.bf16.msra.mxu1 %v2013_v18 }
  0xb8   : > { %1707 = vmatprep.subr.bf16.mxu0 %v2014_v19  ;;  %1829 = vmatprep.subr.bf16.mxu1 %v2014_v19 }
  0xbb   : > { %1708 = vmatpush3.bf16.msra.mxu0 %v2015_v20  ;;  %1837 = vmatpush3.bf16.msra.mxu1 %v2015_v20 }
  0xbc   : > { %1709 = vmatprep.subr.bf16.mxu0 %v2016_v21  ;;  %1830 = vmatprep.subr.bf16.mxu1 %v2016_v21 }
  0xbf   : > { %1710 = vmatpush3.bf16.msra.mxu0 %v2017_v22  ;;  %1838 = vmatpush3.bf16.msra.mxu1 %v2017_v22 }
  0xc2   : > { %633 = vmatmul.mubr.bf16.vlgmr.msra.gmra.mxu0 %v456_v31  ;;  %665 = vmatmul.mubr.bf16.vlgmr.msra.gmra.mxu1 %v464_v32 }
  0xc3   : > { %640 = vmatprep.mubr.bf16.mxu0 %v459_v33  ;;  %672 = vmatprep.mubr.bf16.mxu1 %v467_v34  ;;  %v411_v33 = vld [vmem:[#allocation2 + $0x18] sm:$0xff] }
  0xca   : > { %641 = vmatmul.mubr.bf16.gmra.mxu0 %v458_v43  ;;  %673 = vmatmul.mubr.bf16.gmra.mxu1 %v466_v44  ;;  %v412_v43 = vld [vmem:[#allocation2 + $0x50] sm:$0xff] }
  0xcb   : > { %648 = vmatprep.mubr.bf16.mxu0 %v461_v45  ;;  %680 = vmatprep.mubr.bf16.mxu1 %v469_v46  ;;  %v420_v45 = vld [vmem:[#allocation2 + $0x60] sm:$0xff] }
  0xd2   : > { %649 = vmatmul.mubr.bf16.gmra.mxu0 %v460_v55  ;;  %681 = vmatmul.mubr.bf16.gmra.mxu1 %v468_v56  ;;  %v421_v55 = vld [vmem:[#allocation2 + $0x70] sm:$0xff] }
  0xd3   : > { %656 = vmatprep.mubr.bf16.mxu0 %v463_v57  ;;  %688 = vmatprep.mubr.bf16.mxu1 %v471_v58 }
  0xda   : > { %657 = vmatmul.mubr.bf16.gmra.mxu0 %v462_v63  ;;  %689 = vmatmul.mubr.bf16.gmra.mxu1 %v470_v0  ;;  %v414_v63 = vld [vmem:[#allocation2 + $0x8] sm:$0xff] }
 0x182   : > { %v1711_v1 = vpop.f32.mrf.mxu0  ;;  %v1735_v2 = vpop.f32.mrf.mxu1 }
 0x184   : > { %v1712_v4 = vpop.f32.mrf.mxu0  ;;  %v1736_v6 = vpop.f32.mrf.mxu1 }
 0x185   : > { %v1713_v7 = vadd.f32 %v1712_v4, %v1711_v1  ;;  %v1737_v8 = vadd.f32 %v1736_v6, %v1735_v2  ;;  %v422_v1 = vld [vmem:[#allocation2 + $0x78] sm:$0xff] }
 0x186   : > { %v1714_v9 = vpop.f32.mrf.mxu0  ;;  %v1738_v10 = vpop.f32.mrf.mxu1 }
 0x187   : > { %v697_v11 = vadd.f32 %v1713_v7, %v408_v3  ;;  %v705_v12 = vadd.f32 %v1737_v8, %v416_v5 }
 0x188   : > { %v1715_v14 = vpop.f32.mrf.mxu0  ;;  %v1739_v16 = vpop.f32.mrf.mxu1 }
 0x189   : > { %713 = vst [vmem:[#allocation2 + $0x30] sm:$0xff] %v697_v11  ;;  %721 = vst [vmem:[#allocation2 + $0x40] sm:$0xff] %v705_v12  ;;  %v1716_v17 = vadd.f32 %v1715_v14, %v1714_v9  ;;  %v1740_v18 = vadd.f32 %v1739_v16, %v1738_v10  ;;  %v415_v9 = vld [vmem:[#allocation2 + $0x48] sm:$0xff] }
 0x18a   : > { %v1717_v19 = vpop.f32.mrf.mxu0  ;;  %v1741_v20 = vpop.f32.mrf.mxu1  ;;  %v423_v11 = vld [vmem:[#allocation2 + $0x28] sm:$0xff] }
 0x18b   : > { %v698_v21 = vadd.f32 %v1716_v17, %v409_v13  ;;  %v706_v22 = vadd.f32 %v1740_v18, %v417_v15 }
 0x18c   : > { %v1718_v24 = vpop.f32.mrf.mxu0  ;;  %v1742_v26 = vpop.f32.mrf.mxu1 }
 0x18d   : > { %714 = vst [vmem:[#allocation2] sm:$0xff] %v698_v21  ;;  %722 = vst [vmem:[#allocation2 + $0x20] sm:$0xff] %v706_v22  ;;  %v1719_v27 = vadd.f32 %v1718_v24, %v1717_v19  ;;  %v1743_v28 = vadd.f32 %v1742_v26, %v1741_v20 }
 0x18e   : > { %v1720_v29 = vpop.f32.mrf.mxu0  ;;  %v1744_v30 = vpop.f32.mrf.mxu1 }
 0x18f   : > { %v699_v31 = vadd.f32 %v1719_v27, %v410_v23  ;;  %v707_v32 = vadd.f32 %v1743_v28, %v418_v25 }
 0x190   : > { %v1721_v34 = vpop.f32.mrf.mxu0  ;;  %v1745_v36 = vpop.f32.mrf.mxu1 }
 0x191   : > { %715 = vst [vmem:[#allocation2 + $0x58] sm:$0xff] %v699_v31  ;;  %723 = vst [vmem:[#allocation2 + $0x10] sm:$0xff] %v707_v32  ;;  %v1722_v37 = vadd.f32 %v1721_v34, %v1720_v29  ;;  %v1746_v38 = vadd.f32 %v1745_v36, %v1744_v30 }
 0x192   : > { %v1723_v39 = vpop.f32.mrf.mxu0  ;;  %v1747_v40 = vpop.f32.mrf.mxu1 }
 0x193   : > { %v700_v41 = vadd.f32 %v1722_v37, %v411_v33  ;;  %v708_v42 = vadd.f32 %v1746_v38, %v419_v35 }
 0x194   : > { %v1724_v44 = vpop.f32.mrf.mxu0  ;;  %v1748_v46 = vpop.f32.mrf.mxu1 }
 0x195   : > { %716 = vst [vmem:[#allocation2 + $0x18] sm:$0xff] %v700_v41  ;;  %724 = vst [vmem:[#allocation2 + $0x38] sm:$0xff] %v708_v42  ;;  %v1725_v47 = vadd.f32 %v1724_v44, %v1723_v39  ;;  %v1749_v48 = vadd.f32 %v1748_v46, %v1747_v40 }
 0x196   : > { %v1726_v49 = vpop.f32.mrf.mxu0  ;;  %v1750_v50 = vpop.f32.mrf.mxu1 }
 0x197   : > { %v701_v51 = vadd.f32 %v1725_v47, %v412_v43  ;;  %v709_v52 = vadd.f32 %v1749_v48, %v420_v45 }
 0x198   : > { %v1727_v54 = vpop.f32.mrf.mxu0  ;;  %v1751_v56 = vpop.f32.mrf.mxu1 }
 0x199   : > { %717 = vst [vmem:[#allocation2 + $0x50] sm:$0xff] %v701_v51  ;;  %725 = vst [vmem:[#allocation2 + $0x60] sm:$0xff] %v709_v52  ;;  %v1728_v57 = vadd.f32 %v1727_v54, %v1726_v49  ;;  %v1752_v58 = vadd.f32 %v1751_v56, %v1750_v50 }
 0x19a   : > { %v1729_v59 = vpop.f32.mrf.mxu0  ;;  %v1753_v60 = vpop.f32.mrf.mxu1 }
 0x19b   : > { %v702_v61 = vadd.f32 %v1728_v57, %v413_v53  ;;  %v710_v62 = vadd.f32 %v1752_v58, %v421_v55 }
 0x19c   : > { %v1730_v0 = vpop.f32.mrf.mxu0  ;;  %v1754_v2 = vpop.f32.mrf.mxu1 }
 0x19d   : > { %718 = vst [vmem:[#allocation2 + $0x68] sm:$0xff] %v702_v61  ;;  %726 = vst [vmem:[#allocation2 + $0x70] sm:$0xff] %v710_v62  ;;  %v1731_v3 = vadd.f32 %v1730_v0, %v1729_v59  ;;  %v1755_v4 = vadd.f32 %v1754_v2, %v1753_v60 }
 0x19e   : > { %v1732_v5 = vpop.f32.mrf.mxu0  ;;  %v1756_v6 = vpop.f32.mrf.mxu1 }
 0x19f   : > { %v703_v7 = vadd.f32 %v1731_v3, %v414_v63  ;;  %v711_v8 = vadd.f32 %v1755_v4, %v422_v1 }
 0x1a0   : > { %v1733_v10 = vpop.f32.mrf.mxu0  ;;  %v1757_v12 = vpop.f32.mrf.mxu1 }
 0x1a1   : > { %719 = vst [vmem:[#allocation2 + $0x8] sm:$0xff] %v703_v7  ;;  %727 = vst [vmem:[#allocation2 + $0x78] sm:$0xff] %v711_v8  ;;  %v1734_v13 = vadd.f32 %v1733_v10, %v1732_v5  ;;  %v1758_v14 = vadd.f32 %v1757_v12, %v1756_v6  ;;  %732 = sbr.rel (%p1573_p8) target bundleno = 925 (0x39d), region = 72 }
 0x1a3   : > { %v704_v15 = vadd.f32 %v1734_v13, %v415_v9  ;;  %v712_v16 = vadd.f32 %v1758_v14, %v423_v11 }
 0x1a5   : > { %720 = vst [vmem:[#allocation2 + $0x48] sm:$0xff] %v704_v15  ;;  %728 = vst [vmem:[#allocation2 + $0x28] sm:$0xff] %v712_v16 }
 0x1a6   : > { %v2018_v17 = vld [vmem:[#allocation8 + $0x74] ss:$8 sps:$4 sm:$0xff]   ;;  %v2020_v18 = vld [vmem:[#allocation8 + $0x70] ss:$8 sps:$4 sm:$0xff]   ;;  %v2336_v19 = vmov 0   ;;  %v734_v31 = vld [vmem:[#allocation2] sm:$0xff] }
 0x1a7   : > { %936 = vmatprep.mubr.bf16.mxu0 %v2336_v19  ;;  %904 = vmatprep.subr.bf16.mxu0 %v2018_v17  ;;  %v2021_v20 = vld [vmem:[#allocation8 + $0x64] ss:$8 sps:$4 sm:$0xff]   ;;  %v2023_v21 = vld [vmem:[#allocation8 + $0x60] ss:$8 sps:$4 sm:$0xff]   ;;  %v2024_v22 = vld [vmem:[#allocation8 + $0x54] ss:$8 sps:$4 sm:$0xff]  }
 0x1a8   : > { %905 = vmatpush1.bf16.msra.mxu0 %v2020_v18  ;;  %v2026_v23 = vld [vmem:[#allocation8 + $0x50] ss:$8 sps:$4 sm:$0xff]   ;;  %v2027_v24 = vld [vmem:[#allocation8 + $0x44] ss:$8 sps:$4 sm:$0xff]   ;;  %v2029_v25 = vld [vmem:[#allocation8 + $0x40] ss:$8 sps:$4 sm:$0xff]  }
 0x1a9   : > { %906 = vmatprep.subr.bf16.mxu0 %v2021_v20  ;;  %v2030_v26 = vld [vmem:[#allocation8 + $0x34] ss:$8 sps:$4 sm:$0xff]   ;;  %v2032_v27 = vld [vmem:[#allocation8 + $0x30] ss:$8 sps:$4 sm:$0xff]   ;;  %v2033_v28 = vld [vmem:[#allocation8 + $0x24] ss:$8 sps:$4 sm:$0xff]  }
 0x1aa   : > { %v2035_v29 = vld [vmem:[#allocation8 + $0x20] ss:$8 sps:$4 sm:$0xff]   ;;  %v733_v30 = vld [vmem:[#allocation2 + $0x30] sm:$0xff]  ;;  %v2042_v32 = vld [vmem:[#allocation9 + $0x78] sm:$0xff]  }
 0x1ab   : > { %v2036_v33 = vld [vmem:[#allocation8 + $0x14] ss:$8 sps:$4 sm:$0xff]   ;;  %v2679_v36 = vld [vmem:[%s2924_s17] ss:$0 sm:$0xff]  ;;  %1759 = vmatprep.subr.bf16.mxu1 %v2042_v32  ;;  %v2038_v38 = vld [vmem:[#allocation8 + $0x10] ss:$8 sps:$4 sm:$0xff]  }
 0x1ac   : > { %907 = vmatpush1.bf16.msra.mxu0 %v2023_v21  ;;  %v2043_v34 = vld [vmem:[#allocation9 + $0x38] sm:$0xff]   ;;  %v2044_v35 = vld [vmem:[#allocation9 + $0x70] sm:$0xff]   ;;  %v2046_v39 = vld [vmem:[#allocation9 + $0x68] sm:$0xff]   ;;  %v756_v41 = vadd.f32 %v2679_v36, %v733_v30  ;;  %v757_v42 = vadd.f32 %v2679_v36, %v734_v31 }
 0x1ad   : > { %908 = vmatprep.subr.bf16.mxu0 %v2024_v22  ;;  %1760 = vmatpush3.bf16.msra.mxu1 %v2043_v34  ;;  %v2045_v37 = vld [vmem:[#allocation9 + $0x30] sm:$0xff]   ;;  %v2039_v40 = vld [vmem:[#allocation8 + $0x4] ss:$8 sps:$4 sm:$0xff]   ;;  %v2041_v44 = vld [vmem:[#allocation8] ss:$8 sps:$4 sm:$0xff]  }
 0x1ae   : > { %1761 = vmatprep.subr.bf16.mxu1 %v2044_v35  ;;  %v2047_v43 = vld [vmem:[#allocation9 + $0x28] sm:$0xff]   ;;  %v735_v45 = vld [vmem:[#allocation2 + $0x58] sm:$0xff]  ;;  %v2048_v46 = vld [vmem:[#allocation9 + $0x60] sm:$0xff]   ;;  %v772_v47 = vmax.f32 %v756_v41, 0.0  ;;  %v773_v48 = vmax.f32 %v757_v42, 0.0 }
 0x1af   : > { %v736_v49 = vld [vmem:[#allocation2 + $0x18] sm:$0xff]  ;;  %v2049_v50 = vld [vmem:[#allocation9 + $0x20] sm:$0xff]   ;;  %v758_v53 = vadd.f32 %v2679_v36, %v735_v45  ;;  %v737_v58 = vld [vmem:[#allocation2 + $0x50] sm:$0xff] }
 0x1b0   : > { %909 = vmatpush1.bf16.msra.mxu0 %v2026_v23  ;;  %v2050_v51 = vld [vmem:[#allocation9 + $0x58] sm:$0xff]   ;;  %v788_v52 = vpack.c.bf16 %v773_v48, %v772_v47  ;;  %v759_v54 = vadd.f32 %v2679_v36, %v736_v49  ;;  %v738_v59 = vld [vmem:[#allocation2 + $0x68] sm:$0xff]  ;;  %v760_v61 = vadd.f32 %v2679_v36, %v737_v58  ;;  %v741_v8 = vld [vmem:[#allocation2 + $0x40] sm:$0xff] }
 0x1b1   : > { %910 = vmatprep.subr.bf16.mxu0 %v2027_v24  ;;  %1762 = vmatpush3.bf16.msra.mxu1 %v2045_v37  ;;  %v2051_v55 = vld [vmem:[#allocation9 + $0x18] sm:$0xff]   ;;  %v774_v56 = vmax.f32 %v758_v53, 0.0  ;;  %v761_v62 = vadd.f32 %v2679_v36, %v738_v59  ;;  %v739_v1 = vld [vmem:[#allocation2 + $0x8] sm:$0xff]  ;;  %v742_v9 = vld [vmem:[#allocation2 + $0x20] sm:$0xff]  ;;  %v764_v11 = vadd.f32 %v2679_v36, %v741_v8 }
 0x1b2   : > { %1763 = vmatprep.subr.bf16.mxu1 %v2046_v39  ;;  %v775_v57 = vmax.f32 %v759_v54, 0.0  ;;  %v776_v63 = vmax.f32 %v760_v61, 0.0  ;;  %v740_v2 = vld [vmem:[#allocation2 + $0x48] sm:$0xff]  ;;  %v762_v4 = vadd.f32 %v2679_v36, %v739_v1  ;;  %v765_v12 = vadd.f32 %v2679_v36, %v742_v9  ;;  %v743_v15 = vld [vmem:[#allocation2 + $0x10] sm:$0xff]  ;;  %v744_v16 = vld [vmem:[#allocation2 + $0x38] sm:$0xff] }
 0x1b3   : > { %v777_v0 = vmax.f32 %v761_v62, 0.0  ;;  %v763_v5 = vadd.f32 %v2679_v36, %v740_v2  ;;  %v780_v13 = vmax.f32 %v764_v11, 0.0  ;;  %v766_v18 = vadd.f32 %v2679_v36, %v743_v15  ;;  %v745_v23 = vld [vmem:[#allocation2 + $0x60] sm:$0xff]  ;;  %v746_v24 = vld [vmem:[#allocation2 + $0x70] sm:$0xff]  ;;  %v747_v30 = vld [vmem:[#allocation2 + $0x78] sm:$0xff] }
 0x1b4   : > { %911 = vmatpush1.bf16.msra.mxu0 %v2029_v25  ;;  %v789_v60 = vpack.c.bf16 %v775_v57, %v774_v56  ;;  %v778_v6 = vmax.f32 %v762_v4, 0.0  ;;  %v781_v14 = vmax.f32 %v765_v12, 0.0  ;;  %v767_v20 = vadd.f32 %v2679_v36, %v744_v16  ;;  %v748_v31 = vld [vmem:[#allocation2 + $0x28] sm:$0xff]  ;;  %v2052_v39 = vld [vmem:[#allocation9 + $0x50] sm:$0xff]  }
 0x1b5   : > { %912 = vmatprep.subr.bf16.mxu0 %v2030_v26  ;;  %1764 = vmatpush3.bf16.msra.mxu1 %v2047_v43  ;;  %v790_v3 = vpack.c.bf16 %v777_v0, %v776_v63  ;;  %v779_v7 = vmax.f32 %v763_v5, 0.0  ;;  %v782_v21 = vmax.f32 %v766_v18, 0.0  ;;  %v768_v26 = vadd.f32 %v2679_v36, %v745_v23  ;;  %v2054_v41 = vld [vmem:[#allocation9 + $0x48] sm:$0xff]   ;;  %v2056_v43 = vld [vmem:[#allocation9 + $0x40] sm:$0xff]  }
 0x1b6   : > { %1765 = vmatprep.subr.bf16.mxu1 %v2048_v46  ;;  %v792_v17 = vpack.c.bf16 %v781_v14, %v780_v13  ;;  %v783_v22 = vmax.f32 %v767_v20, 0.0  ;;  %v771_v34 = vadd.f32 %v2679_v36, %v748_v31  ;;  %v2055_v42 = vld [vmem:[#allocation9 + $0x8] sm:$0xff]  }
 0x1b7   : > { %v791_v10 = vpack.c.bf16 %v779_v7, %v778_v6 }
 0x1b8   : > { %913 = vmatpush1.bf16.msra.mxu0 %v2032_v27  ;;  %v793_v25 = vpack.c.bf16 %v783_v22, %v782_v21  ;;  %v769_v27 = vadd.f32 %v2679_v36, %v746_v24  ;;  %v787_v37 = vmax.f32 %v771_v34, 0.0 }
 0x1b9   : > { %914 = vmatprep.subr.bf16.mxu0 %v2033_v28  ;;  %1766 = vmatpush3.bf16.msra.mxu1 %v2049_v50  ;;  %v784_v28 = vmax.f32 %v768_v26, 0.0 }
 0x1ba   : > { %1767 = vmatprep.subr.bf16.mxu1 %v2050_v51 }
 0x1bc   : > { %915 = vmatpush1.bf16.msra.mxu0 %v2035_v29  ;;  %v785_v29 = vmax.f32 %v769_v27, 0.0 }
 0x1bd   : > { %916 = vmatprep.subr.bf16.mxu0 %v2036_v33  ;;  %1768 = vmatpush3.bf16.msra.mxu1 %v2051_v55  ;;  %v770_v33 = vadd.f32 %v2679_v36, %v747_v30  ;;  %v814_v36 = vlaneseq }
 0x1be   : > { %v794_v32 = vpack.c.bf16 %v785_v29, %v784_v28  ;;  %1769 = vmatprep.subr.bf16.mxu1 %v2052_v39 }
 0x1bf   : > { %v786_v35 = vmax.f32 %v770_v33, 0.0  ;;  %v815_v45 = vshrl.u32 %v814_v36, 7 }
 0x1c0   : > { %917 = vmatpush1.bf16.msra.mxu0 %v2038_v38 }
 0x1c1   : > { %918 = vmatprep.subr.bf16.mxu0 %v2039_v40  ;;  %v795_v38 = vpack.c.bf16 %v787_v37, %v786_v35  ;;  %v2053_v40 = vld [vmem:[#allocation9 + $0x10] sm:$0xff]   ;;  %v820_v46 = vsub.s32 1, %v815_v45  ;;  %v816_v47 = vsub.s32 0, %v815_v45 }
 0x1c2   : > { %1770 = vmatpush3.bf16.msra.mxu1 %v2053_v40 }
 0x1c3   : > { %1771 = vmatprep.subr.bf16.mxu1 %v2054_v41 }
 0x1c4   : > { %919 = vmatpush1.bf16.msra.mxu0 %v2041_v44  ;;  %v2057_v44 = vld [vmem:[#allocation9] sm:$0xff]  }
 0x1c6   : > { %1772 = vmatpush3.bf16.msra.mxu1 %v2055_v42 }
 0x1c7   : > { %937 = vmatmul.mubr.bf16.vlgmr.msra.gmra.mxu0 %v788_v52  ;;  %1773 = vmatprep.subr.bf16.mxu1 %v2056_v43 }
 0x1c8   : > { %946 = vmatprep.mubr.bf16.mxu0 %v2336_v19 }
 0x1ca   : > { %1774 = vmatpush3.bf16.msra.mxu1 %v2057_v44 }
 0x1cf   : > { %947 = vmatmul.mubr.bf16.gmra.mxu0 %v789_v60 }
 0x1d0   : > { %956 = vmatprep.mubr.bf16.mxu0 %v2336_v19 }
 0x1d7   : > { %957 = vmatmul.mubr.bf16.gmra.mxu0 %v790_v3 }
 0x1d8   : > { %966 = vmatprep.mubr.bf16.mxu0 %v2336_v19 }
 0x1df   : > { %967 = vmatmul.mubr.bf16.gmra.mxu0 %v791_v10 }
 0x1e0   : > { %976 = vmatprep.mubr.bf16.mxu0 %v2336_v19 }
 0x1e7   : > { %977 = vmatmul.mubr.bf16.gmra.mxu0 %v792_v17 }
 0x1e8   : > { %986 = vmatprep.mubr.bf16.mxu0 %v2336_v19 }
 0x1ef   : > { %987 = vmatmul.mubr.bf16.gmra.mxu0 %v793_v25 }
 0x1f0   : > { %996 = vmatprep.mubr.bf16.mxu0 %v2336_v19 }
 0x1f7   : > { %997 = vmatmul.mubr.bf16.gmra.mxu0 %v794_v32 }
 0x1f8   : > { %1006 = vmatprep.mubr.bf16.mxu0 %v2336_v19  ;;  %v812_v19 = vld [vmem:[%s2925_s7] sm:$0x3] }
 0x1f9   : > { %v2707_v49 = vrot.slane %v812_v19, %v820_v46  ;;  %v2709_v50 = vrot.slane %v812_v19, %v816_v47 }
 0x1ff   : > { %1007 = vmatmul.mubr.bf16.gmra.mxu0 %v795_v38 }
 0x287   : > { %v938_v48 = vpop.f32.mrf.mxu0 }
 0x288   : > { %v939_v55 = vadd.f32 %v938_v48, %v2709_v50 }
 0x289   : > { %v940_v51 = vpop.f32.mrf.mxu0 }
 0x28a   : > { %v941_v53 = vadd.f32 %v940_v51, %v2707_v49  ;;  %v1017_v62 = vmax.f32 %v939_v55, 0.0 }
 0x28b   : > { %v942_v52 = vpop.f32.mrf.mxu0 }
 0x28c   : > { %v943_v54 = vadd.f32 %v942_v52, %v2709_v50  ;;  %v1018_v60 = vmax.f32 %v941_v53, 0.0 }
 0x28d   : > { %v944_v56 = vpop.f32.mrf.mxu0 }
 0x28e   : > { %v945_v57 = vadd.f32 %v944_v56, %v2707_v49  ;;  %v1019_v58 = vmax.f32 %v943_v54, 0.0 }
 0x28f   : > { %v948_v59 = vpop.f32.mrf.mxu0 }
 0x290   : > { %v1020_v61 = vmax.f32 %v945_v57, 0.0  ;;  %v1049_v1 = vpack.c.bf16 %v1019_v58, %v1017_v62  ;;  %v949_v5 = vadd.f32 %v948_v59, %v2709_v50 }
 0x291   : > { %v950_v63 = vpop.f32.mrf.mxu0 }
 0x292   : > { %v1050_v0 = vpack.c.bf16 %v1020_v61, %v1018_v60  ;;  %v951_v3 = vadd.f32 %v950_v63, %v2707_v49  ;;  %v1021_v12 = vmax.f32 %v949_v5, 0.0 }
 0x293   : > { %v952_v2 = vpop.f32.mrf.mxu0 }
 0x294   : > { %v953_v4 = vadd.f32 %v952_v2, %v2709_v50  ;;  %1232 = vmatprep.mubr.bf16.mxu1 %v1050_v0  ;;  %v1022_v10 = vmax.f32 %v951_v3, 0.0 }
 0x295   : > { %v954_v6 = vpop.f32.mrf.mxu0  ;;  %1233 = vmatmul.mubr.bf16.vlgmr.msra.gmra.mxu1 %v1049_v1 }
 0x296   : > { %v955_v7 = vadd.f32 %v954_v6, %v2707_v49  ;;  %v1023_v8 = vmax.f32 %v953_v4, 0.0 }
 0x297   : > { %v958_v9 = vpop.f32.mrf.mxu0 }
 0x298   : > { %v1024_v11 = vmax.f32 %v955_v7, 0.0  ;;  %v1051_v15 = vpack.c.bf16 %v1023_v8, %v1021_v12  ;;  %v959_v20 = vadd.f32 %v958_v9, %v2709_v50 }
 0x299   : > { %v960_v13 = vpop.f32.mrf.mxu0 }
 0x29a   : > { %v1052_v14 = vpack.c.bf16 %v1024_v11, %v1022_v10  ;;  %v961_v17 = vadd.f32 %v960_v13, %v2707_v49  ;;  %v1025_v27 = vmax.f32 %v959_v20, 0.0 }
 0x29b   : > { %v962_v16 = vpop.f32.mrf.mxu0 }
 0x29c   : > { %v963_v18 = vadd.f32 %v962_v16, %v2709_v50  ;;  %1240 = vmatprep.mubr.bf16.mxu1 %v1052_v14  ;;  %v1026_v25 = vmax.f32 %v961_v17, 0.0 }
 0x29d   : > { %v964_v21 = vpop.f32.mrf.mxu0  ;;  %1241 = vmatmul.mubr.bf16.gmra.mxu1 %v1051_v15 }
 0x29e   : > { %v965_v22 = vadd.f32 %v964_v21, %v2707_v49  ;;  %v1027_v23 = vmax.f32 %v963_v18, 0.0 }
 0x29f   : > { %v968_v24 = vpop.f32.mrf.mxu0 }
 0x2a0   : > { %v1028_v26 = vmax.f32 %v965_v22, 0.0  ;;  %v1053_v30 = vpack.c.bf16 %v1027_v23, %v1025_v27  ;;  %v969_v34 = vadd.f32 %v968_v24, %v2709_v50 }
 0x2a1   : > { %v970_v28 = vpop.f32.mrf.mxu0 }
 0x2a2   : > { %v1054_v29 = vpack.c.bf16 %v1028_v26, %v1026_v25  ;;  %v971_v32 = vadd.f32 %v970_v28, %v2707_v49  ;;  %v1029_v42 = vmax.f32 %v969_v34, 0.0 }
 0x2a3   : > { %v972_v31 = vpop.f32.mrf.mxu0 }
 0x2a4   : > { %v973_v33 = vadd.f32 %v972_v31, %v2709_v50  ;;  %1248 = vmatprep.mubr.bf16.mxu1 %v1054_v29  ;;  %v1030_v40 = vmax.f32 %v971_v32, 0.0 }
 0x2a5   : > { %v974_v35 = vpop.f32.mrf.mxu0  ;;  %1249 = vmatmul.mubr.bf16.gmra.mxu1 %v1053_v30 }
 0x2a6   : > { %v975_v37 = vadd.f32 %v974_v35, %v2707_v49  ;;  %v1031_v38 = vmax.f32 %v973_v33, 0.0 }
 0x2a7   : > { %v978_v39 = vpop.f32.mrf.mxu0 }
 0x2a8   : > { %v1032_v41 = vmax.f32 %v975_v37, 0.0  ;;  %v1055_v36 = vpack.c.bf16 %v1031_v38, %v1029_v42  ;;  %v979_v19 = vadd.f32 %v978_v39, %v2709_v50 }
 0x2a9   : > { %v980_v43 = vpop.f32.mrf.mxu0 }
 0x2aa   : > { %v1056_v44 = vpack.c.bf16 %v1032_v41, %v1030_v40  ;;  %v981_v46 = vadd.f32 %v980_v43, %v2707_v49  ;;  %v1033_v56 = vmax.f32 %v979_v19, 0.0 }
 0x2ab   : > { %v982_v45 = vpop.f32.mrf.mxu0 }
 0x2ac   : > { %v983_v47 = vadd.f32 %v982_v45, %v2709_v50  ;;  %1256 = vmatprep.mubr.bf16.mxu1 %v1056_v44  ;;  %v1034_v54 = vmax.f32 %v981_v46, 0.0 }
 0x2ad   : > { %v984_v48 = vpop.f32.mrf.mxu0  ;;  %1257 = vmatmul.mubr.bf16.gmra.mxu1 %v1055_v36 }
 0x2ae   : > { %v985_v51 = vadd.f32 %v984_v48, %v2707_v49  ;;  %v1035_v52 = vmax.f32 %v983_v47, 0.0 }
 0x2af   : > { %v988_v53 = vpop.f32.mrf.mxu0 }
 0x2b0   : > { %v1036_v55 = vmax.f32 %v985_v51, 0.0  ;;  %v1057_v59 = vpack.c.bf16 %v1035_v52, %v1033_v56  ;;  %v989_v63 = vadd.f32 %v988_v53, %v2709_v50 }
 0x2b1   : > { %v990_v57 = vpop.f32.mrf.mxu0 }
 0x2b2   : > { %v1058_v58 = vpack.c.bf16 %v1036_v55, %v1034_v54  ;;  %v991_v61 = vadd.f32 %v990_v57, %v2707_v49  ;;  %v1037_v6 = vmax.f32 %v989_v63, 0.0 }
 0x2b3   : > { %v992_v60 = vpop.f32.mrf.mxu0 }
 0x2b4   : > { %v993_v62 = vadd.f32 %v992_v60, %v2709_v50  ;;  %1264 = vmatprep.mubr.bf16.mxu1 %v1058_v58  ;;  %v1038_v4 = vmax.f32 %v991_v61, 0.0 }
 0x2b5   : > { %v994_v0 = vpop.f32.mrf.mxu0  ;;  %1265 = vmatmul.mubr.bf16.gmra.mxu1 %v1057_v59 }
 0x2b6   : > { %v995_v1 = vadd.f32 %v994_v0, %v2707_v49  ;;  %v1039_v2 = vmax.f32 %v993_v62, 0.0 }
 0x2b7   : > { %v998_v3 = vpop.f32.mrf.mxu0 }
 0x2b8   : > { %v1040_v5 = vmax.f32 %v995_v1, 0.0  ;;  %v1059_v9 = vpack.c.bf16 %v1039_v2, %v1037_v6  ;;  %v999_v13 = vadd.f32 %v998_v3, %v2709_v50 }
 0x2b9   : > { %v1000_v7 = vpop.f32.mrf.mxu0 }
 0x2ba   : > { %v1060_v8 = vpack.c.bf16 %v1040_v5, %v1038_v4  ;;  %v1001_v11 = vadd.f32 %v1000_v7, %v2707_v49  ;;  %v1041_v21 = vmax.f32 %v999_v13, 0.0 }
 0x2bb   : > { %v1002_v10 = vpop.f32.mrf.mxu0 }
 0x2bc   : > { %v1003_v12 = vadd.f32 %v1002_v10, %v2709_v50  ;;  %1272 = vmatprep.mubr.bf16.mxu1 %v1060_v8  ;;  %v1042_v18 = vmax.f32 %v1001_v11, 0.0 }
 0x2bd   : > { %v1004_v14 = vpop.f32.mrf.mxu0  ;;  %1273 = vmatmul.mubr.bf16.gmra.mxu1 %v1059_v9 }
 0x2be   : > { %v1005_v15 = vadd.f32 %v1004_v14, %v2707_v49  ;;  %v1043_v16 = vmax.f32 %v1003_v12, 0.0 }
 0x2bf   : > { %v1008_v17 = vpop.f32.mrf.mxu0 }
 0x2c0   : > { %v1044_v20 = vmax.f32 %v1005_v15, 0.0  ;;  %v1061_v24 = vpack.c.bf16 %v1043_v16, %v1041_v21  ;;  %v1009_v28 = vadd.f32 %v1008_v17, %v2709_v50 }
 0x2c1   : > { %v1010_v22 = vpop.f32.mrf.mxu0 }
 0x2c2   : > { %v1062_v23 = vpack.c.bf16 %v1044_v20, %v1042_v18  ;;  %v1011_v26 = vadd.f32 %v1010_v22, %v2707_v49  ;;  %v1045_v34 = vmax.f32 %v1009_v28, 0.0 }
 0x2c3   : > { %v1012_v25 = vpop.f32.mrf.mxu0 }
 0x2c4   : > { %v1013_v27 = vadd.f32 %v1012_v25, %v2709_v50  ;;  %1280 = vmatprep.mubr.bf16.mxu1 %v1062_v23  ;;  %v1046_v32 = vmax.f32 %v1011_v26, 0.0  ;;  %v2746_v50 = vld [vmem:[%s2926_s13] ss:$0 sm:$0xff] }
 0x2c5   : > { %v1014_v29 = vpop.f32.mrf.mxu0  ;;  %1281 = vmatmul.mubr.bf16.gmra.mxu1 %v1061_v24 }
 0x2c6   : > { %v1015_v30 = vadd.f32 %v1014_v29, %v2707_v49  ;;  %v1047_v31 = vmax.f32 %v1013_v27, 0.0 }
 0x2c8   : > { %v1048_v33 = vmax.f32 %v1015_v30, 0.0  ;;  %v1063_v37 = vpack.c.bf16 %v1047_v31, %v1045_v34 }
 0x2ca   : > { %v1064_v35 = vpack.c.bf16 %v1048_v33, %v1046_v32 }
 0x2cc   : > { %1288 = vmatprep.mubr.bf16.mxu1 %v1064_v35 }
 0x2cd   : > { %1289 = vmatmul.mubr.bf16.gmra.mxu1 %v1063_v37 }
 0x355   : > { %v1775_v38 = vpop.f32.mrf.mxu1 }
 0x357   : > { %v1776_v39 = vpop.f32.mrf.mxu1 }
 0x358   : > { %v1777_v40 = vadd.f32 %v1776_v39, %v1775_v38 }
 0x359   : > { %v1778_v41 = vpop.f32.mrf.mxu1 }
 0x35a   : > { %v1235_v49 = vadd.f32 %v1777_v40, %v2746_v50 }
 0x35b   : > { %v1779_v42 = vpop.f32.mrf.mxu1 }
 0x35c   : > { %v1780_v43 = vadd.f32 %v1779_v42, %v1778_v41  ;;  %v1297_v46 = vmax.f32 %v1235_v49, 0.0 }
 0x35d   : > { %v1781_v44 = vpop.f32.mrf.mxu1 }
 0x35e   : > { %v1238_v36 = vadd.f32 %v1780_v43, %v2746_v50 }
 0x35f   : > { %v1782_v45 = vpop.f32.mrf.mxu1 }
 0x360   : > { %v1298_v47 = vmax.f32 %v1238_v36, 0.0  ;;  %v1783_v19 = vadd.f32 %v1782_v45, %v1781_v44 }
 0x361   : > { %v1784_v48 = vpop.f32.mrf.mxu1 }
 0x362   : > { %v1651_v51 = vpack.c.bf16 %v1298_v47, %v1297_v46  ;;  %v1243_v53 = vadd.f32 %v1783_v19, %v2746_v50 }
 0x363   : > { %v1785_v52 = vpop.f32.mrf.mxu1 }
 0x364   : > { %1652 = vst [vmem:[%s2623_s30] sm:$0xff] %v1651_v51   ;;  %v1786_v54 = vadd.f32 %v1785_v52, %v1784_v48  ;;  %v1299_v58 = vmax.f32 %v1243_v53, 0.0 }
 0x365   : > { %v1787_v55 = vpop.f32.mrf.mxu1 }
 0x366   : > { %v1246_v56 = vadd.f32 %v1786_v54, %v2746_v50 }
 0x367   : > { %v1788_v57 = vpop.f32.mrf.mxu1 }
 0x368   : > { %v1300_v59 = vmax.f32 %v1246_v56, 0.0  ;;  %v1789_v60 = vadd.f32 %v1788_v57, %v1787_v55 }
 0x369   : > { %v1790_v61 = vpop.f32.mrf.mxu1 }
 0x36a   : > { %v1656_v62 = vpack.c.bf16 %v1300_v59, %v1299_v58  ;;  %v1251_v0 = vadd.f32 %v1789_v60, %v2746_v50 }
 0x36b   : > { %v1791_v63 = vpop.f32.mrf.mxu1 }
 0x36c   : > { %1688 = vst [vmem:[%s2623_s30 + $0x8] sm:$0xff] %v1656_v62   ;;  %v1792_v1 = vadd.f32 %v1791_v63, %v1790_v61  ;;  %v1301_v5 = vmax.f32 %v1251_v0, 0.0 }
 0x36d   : > { %v1793_v2 = vpop.f32.mrf.mxu1 }
 0x36e   : > { %v1254_v3 = vadd.f32 %v1792_v1, %v2746_v50 }
 0x36f   : > { %v1794_v4 = vpop.f32.mrf.mxu1 }
 0x370   : > { %v1302_v6 = vmax.f32 %v1254_v3, 0.0  ;;  %v1795_v7 = vadd.f32 %v1794_v4, %v1793_v2 }
 0x371   : > { %v1796_v8 = vpop.f32.mrf.mxu1 }
 0x372   : > { %v1661_v9 = vpack.c.bf16 %v1302_v6, %v1301_v5  ;;  %v1259_v11 = vadd.f32 %v1795_v7, %v2746_v50 }
 0x373   : > { %v1797_v10 = vpop.f32.mrf.mxu1 }
 0x374   : > { %1689 = vst [vmem:[%s2623_s30 + $0x10] sm:$0xff] %v1661_v9   ;;  %v1798_v12 = vadd.f32 %v1797_v10, %v1796_v8  ;;  %v1303_v16 = vmax.f32 %v1259_v11, 0.0 }
 0x375   : > { %v1799_v13 = vpop.f32.mrf.mxu1 }
 0x376   : > { %v1262_v14 = vadd.f32 %v1798_v12, %v2746_v50 }
 0x377   : > { %v1800_v15 = vpop.f32.mrf.mxu1 }
 0x378   : > { %v1304_v17 = vmax.f32 %v1262_v14, 0.0  ;;  %v1801_v18 = vadd.f32 %v1800_v15, %v1799_v13 }
 0x379   : > { %v1802_v20 = vpop.f32.mrf.mxu1 }
 0x37a   : > { %v1666_v21 = vpack.c.bf16 %v1304_v17, %v1303_v16  ;;  %v1267_v23 = vadd.f32 %v1801_v18, %v2746_v50 }
 0x37b   : > { %v1803_v22 = vpop.f32.mrf.mxu1 }
 0x37c   : > { %1690 = vst [vmem:[%s2623_s30 + $0x18] sm:$0xff] %v1666_v21   ;;  %v1804_v24 = vadd.f32 %v1803_v22, %v1802_v20  ;;  %v1305_v28 = vmax.f32 %v1267_v23, 0.0 }
 0x37d   : > { %v1805_v25 = vpop.f32.mrf.mxu1 }
 0x37e   : > { %v1270_v26 = vadd.f32 %v1804_v24, %v2746_v50 }
 0x37f   : > { %v1806_v27 = vpop.f32.mrf.mxu1 }
 0x380   : > { %v1306_v29 = vmax.f32 %v1270_v26, 0.0  ;;  %v1807_v30 = vadd.f32 %v1806_v27, %v1805_v25 }
 0x381   : > { %v1808_v31 = vpop.f32.mrf.mxu1 }
 0x382   : > { %v1671_v32 = vpack.c.bf16 %v1306_v29, %v1305_v28  ;;  %v1275_v34 = vadd.f32 %v1807_v30, %v2746_v50 }
 0x383   : > { %v1809_v33 = vpop.f32.mrf.mxu1 }
 0x384   : > { %1691 = vst [vmem:[%s2623_s30 + $0x20] sm:$0xff] %v1671_v32   ;;  %v1810_v35 = vadd.f32 %v1809_v33, %v1808_v31  ;;  %v1307_v40 = vmax.f32 %v1275_v34, 0.0 }
 0x385   : > { %v1811_v37 = vpop.f32.mrf.mxu1 }
 0x386   : > { %v1278_v38 = vadd.f32 %v1810_v35, %v2746_v50 }
 0x387   : > { %v1812_v39 = vpop.f32.mrf.mxu1 }
 0x388   : > { %v1308_v41 = vmax.f32 %v1278_v38, 0.0  ;;  %v1813_v42 = vadd.f32 %v1812_v39, %v1811_v37 }
 0x389   : > { %v1814_v49 = vpop.f32.mrf.mxu1 }
 0x38a   : > { %v1676_v43 = vpack.c.bf16 %v1308_v41, %v1307_v40  ;;  %v1283_v36 = vadd.f32 %v1813_v42, %v2746_v50 }
 0x38b   : > { %v1815_v44 = vpop.f32.mrf.mxu1 }
 0x38c   : > { %1692 = vst [vmem:[%s2623_s30 + $0x28] sm:$0xff] %v1676_v43   ;;  %v1816_v45 = vadd.f32 %v1815_v44, %v1814_v49  ;;  %v1309_v48 = vmax.f32 %v1283_v36, 0.0 }
 0x38d   : > { %v1817_v46 = vpop.f32.mrf.mxu1 }
 0x38e   : > { %v1286_v47 = vadd.f32 %v1816_v45, %v2746_v50 }
 0x38f   : > { %v1818_v19 = vpop.f32.mrf.mxu1 }
 0x390   : > { %v1310_v51 = vmax.f32 %v1286_v47, 0.0  ;;  %v1819_v52 = vadd.f32 %v1818_v19, %v1817_v46 }
 0x391   : > { %v1820_v53 = vpop.f32.mrf.mxu1 }
 0x392   : > { %v1681_v54 = vpack.c.bf16 %v1310_v51, %v1309_v48  ;;  %v1291_v56 = vadd.f32 %v1819_v52, %v2746_v50 }
 0x393   : > { %v1821_v55 = vpop.f32.mrf.mxu1 }
 0x394   : > { %1693 = vst [vmem:[%s2623_s30 + $0x30] sm:$0xff] %v1681_v54   ;;  %v1822_v57 = vadd.f32 %v1821_v55, %v1820_v53  ;;  %v1311_v59 = vmax.f32 %v1291_v56, 0.0 }
 0x396   : > { %v1294_v58 = vadd.f32 %v1822_v57, %v2746_v50 }
 0x398   : > { %v1312_v60 = vmax.f32 %v1294_v58, 0.0 }
 0x39a   : > { %v1686_v61 = vpack.c.bf16 %v1312_v60, %v1311_v59 }
 0x39c   : > { %1694 = vst [vmem:[%s2623_s30 + $0x38] sm:$0xff] %v1686_v61  }
 0x39d PF: > { %s2927_s4 = sld [smem:[#allocation20_spill]]  ;;  %s1407_s15 = sshll.u32 %s2623_s30, 4  ;;  %s2779_s15 = int_to_ptr.vmem [resolvable:$true] %s1407_s15 }
 0x39e   : > { %s2929_s6 = sld [smem:[#allocation23_spill]]  ;;  %s2783_s10 = scalar_lea.sflag [#allocation5], %s380_s19 }
 0x39f   : > { %s2930_s23 = sld [smem:[#allocation33_spill]]  ;;  %s2166_s25 = scalar_lea.vmem %s2779_s15, 1024 }
 0x3a0   : > { %p2167_p9 = scmp.ne.s32.totalorder %s2779_s15, %s2166_s25  ;;  %s2337_s17 = smov [#allocation11]  }
 0x3a1   : > { %s2170_s20 = sshll.u32 %s2337_s17, 4  ;;  %s2171_s20 = int_to_ptr.vmem [resolvable:$false] %s2170_s20 }
 0x3a2   : > { %s2172_s24 = scalar_lea.vmem %s2171_s20, 2048  ;;  %p2173_p12 = scmp.lt.s32.totalorder %s2779_s15, %s2171_s20 }
 0x3a3   : > { %s1647_s22 = sshll.u32 %s2927_s4, 10  ;;  %p2174_p4 = scmp.lt.s32.totalorder %s2172_s24, %s2166_s25 }
 0x3a4   : > { %p2931_p7 = scmp.ne.s32.totalorder %s2929_s6, 0 }
 0x3a5   : > { %s2776_s5 = scalar_lea.hbm %s2930_s23, %s1647_s22  ;;  %p2175_p0 = por %p2174_p4, %p2173_p12 }
 0x3a6   : > { %p2168_p5 = pnand %p2167_p9, %p2931_p7 }
 0x3a8   : > { %p2169_p2 = pneg %p2168_p5 }
 0x3aa   : > { %p2176_p13 = pnand %p2175_p0, %p2169_p2 }
 0x3ac   : > { %2179 = shalt.err (!%p2176_p13)
}
 0x3ad   : > { %s2180_s19 = scalar_lea.hbm %s2776_s5, 1024  ;;  %s2184_s16 = scalar_lea.hbm %s2930_s23, 2048 }
 0x3ae   : > { %p2181_p6 = scmp.ne.s32.totalorder %s2776_s5, %s2180_s19  ;;  %p2185_p11 = scmp.lt.s32.totalorder %s2776_s5, %s2930_s23 }
 0x3af   : > { %p2186_p1 = scmp.lt.s32.totalorder %s2184_s16, %s2180_s19 }
 0x3b0   : > { %p2182_p10 = pnand %p2181_p6, %p2931_p7 }
 0x3b1   : > { %p2187_p8 = por %p2186_p1, %p2185_p11 }
 0x3b2   : > { %p2183_p3 = pneg %p2182_p10 }
 0x3b4   : > { %p2188_p9 = pnand %p2187_p8, %p2183_p3 }
 0x3b6   : > { %2191 = shalt.err (!%p2188_p9)
}
 0x3b7   : > { %s2338_s4 = smov 64   ;;  %s2339_s0 = smov 4  }
 0x3b8   : > { %1851 = dma.vmem_to_hbm [thread:$0]  (%p2931_p7), %s2779_s15, 1024, %s2776_s5, %s2783_s10, %s2338_s4, %s2338_s4, %s2339_s0  }
 0x3b9 PF: > { %s2932_s22 = sld [smem:[#allocation17_spill]]  ;;  %p1876_p5 = scmp.ge.s32.totalorder %s2322_s14, 2 }
 0x3ba   : > { %s2933_s2 = sld [smem:[#allocation24_spill]] }
 0x3bf   : > { %s1422_s18 = sand.u32 1, %s2932_s22  }
 0x3c0   : > { %p2934_p2 = scmp.ne.s32.totalorder %s2933_s2, 0  ;;  %s1423_s25 = scalar_lea.sflag [#allocation5], %s1422_s18 }
 0x3c2   : > { %p1868_p12 = pnand %p1876_p5, %p2934_p2 }
 0x3c4   : > { %p1869_p4 = pneg %p1868_p12 }
 0x3c6   : > { %2265 = dma.done.wait (%p1869_p4), %s1423_s25, 1024  }
 0x3c7   : > { %2267 = vsyncadd (%p1869_p4), %s1423_s25, 4294966272  ;;  %s27_s14 = sadd.s32 1, %s2322_s14   ;;  %s2936_s24 = sld [smem:[#allocation18_spill]] }
 0x3c8   : > { %p2811_p0 = scmp.ge.s32.totalorder %s27_s14, 6   ;;  %s2937_s6 = sld [smem:[#allocation21_spill]] }
 0x3c9   : > { %s2938_s5 = sld [smem:[#allocation25_spill]]  ;;  %s2940_s25 = smov %s2278_s26 }
 0x3ca   : > { %s2939_s13 = sld [smem:[#allocation26_spill]]  ;;  %s2941_s26 = smov %s2545_s27 }
 0x3cb   : > { %s2942_s27 = smov %s2286_s28  ;;  %s2943_s28 = smov %s2290_s29 }
 0x3cc   : > { %s2944_s29 = smov %s2573_s21  ;;  %s2945_s30 = smov %s2298_s8 }
 0x3cd   : > { %s2946_s8 = smov %s2302_s9  ;;  %s2947_s9 = smov %s2548_s11 }
 0x3ce   : > { %s2948_s10 = smov %s2314_s12  ;;  %s2949_s11 = smov %s2937_s6 }
 0x3cf   : > { %s2950_s12 = smov %s2938_s5  ;;  %26 = sbr.rel (!%p2811_p0) target bundleno = 21 (0x15), region = 122 }
 0x3d4   :  { %1428 = vsyncpa [#allocation4], 1 }
 0x3d5   :  { %1430 = vsyncpa [#allocation4 + $0x1], 1 }
 0x3d6   :  { %1431 = vsyncpa [#allocation7], 1 }
 0x3d7   :  { %1433 = vsyncpa [#allocation7 + $0x1], 1 }
 0x3d8   :  { %1434 = vsyncpa [#allocation10], 1 }
 0x3d9   :  { %1435 = vsyncpa [#allocation5], 1 }
 0x3da   :  { %1437 = vsyncpa [#allocation5 + $0x1], 1 }

</bundles_post_ra>
